<compile_context>
chip_gen: v6e
topology: v6e:2x2x1
jax: 0.10.0
libtpu: 0.0.40
codegen_flags: <defaults>
</compile_context>

<pallas_src>
import functools

import jax
import jax.numpy as jnp
from jax.experimental import pallas as pl
from jax.experimental.pallas import tpu as pltpu

# Explicit matmul precision.  DEFAULT = same lowering as before (runs clean);
# HIGHEST = strict fp32 parity with the PyTorch fp32 module; or cast operands
# to bf16 for the fastest serial LSTM chain on v6e/v7x.
_PRECISION = jax.lax.Precision.DEFAULT


def _round_up(x, m):
    return (x + m - 1) // m * m


# --------------------------------------------------------------------------
# Fully fused forward kernel
# --------------------------------------------------------------------------
def mortality_kernel(vit_ref, not_ref, demo_ref, ypred_ref, slab_ref, out_ref,
                     *, offs, B, T, H):
    f32 = jnp.float32

    def w(name):
        o, r, c = offs[name]          # static Python ints -> static ref slice
        return slab_ref[o:o + r, 0:c]

    def linear(x, wname, bname, relu=False):
        y = jnp.dot(x, w(wname), preferred_element_type=f32,
                    precision=_PRECISION) + w(bname)
        return jnp.maximum(y, 0.0) if relu else y

    # ---- per-stream input projections (bulk matmuls, off the serial path) --
    # PyTorch: F.relu(Sequential(Linear, Linear)(x))  — ReLU only at the end.
    v_proj = linear(linear(vit_ref[...], "v_w1", "v_b1"), "v_w2", "v_b2",
                    relu=True)                                        # (T*B, H)
    n_proj = linear(linear(not_ref[...], "n_w1", "n_b1"), "n_w2", "n_b2",
                    relu=True)                                        # (T*B, H)

    # ---- fused dual-LSTM --------------------------------------------------
    # Hoisted input projection for BOTH LSTMs and all T steps in one matmul
    # against the block-diagonal input weight (grouped-gate column layout).
    x_cat = jnp.concatenate([v_proj, n_proj], axis=1)                 # (T*B, 2H)
    xw = jnp.dot(x_cat, w("lstm_win"), preferred_element_type=f32,
                 precision=_PRECISION) + w("lstm_b")                  # (T*B, 8H)
    w_r = w("lstm_wr")        # (2H, 8H) block-diagonal recurrent weight (hoisted)

    h = jnp.zeros((B, 2 * H), f32)    # [h_vitals | h_notes]
    c = jnp.zeros((B, 2 * H), f32)
    G = 2 * H                         # lanes per grouped gate
    # T is small and static: full unroll => single basic block, one recurrent
    # MXU push per step; gate math rides on VPU/EUP slack.
    for t in range(T):
        pre = xw[t * B:(t + 1) * B, :] + jnp.dot(
            h, w_r, preferred_element_type=f32, precision=_PRECISION)  # (B, 8H)
        gi = jax.nn.sigmoid(pre[:, 0 * G:1 * G])
        gf = jax.nn.sigmoid(pre[:, 1 * G:2 * G])
        gg = jnp.tanh(pre[:, 2 * G:3 * G])
        go = jax.nn.sigmoid(pre[:, 3 * G:4 * G])
        c = gf * c + gi * gg
        h = go * jnp.tanh(c)
    # h == [vitals_last | notes_last]  (B, 2H) — already in fc3's input order.

    # ---- demo and y_pred heads ---------------------------------------------
    d = linear(linear(demo_ref[...], "d_w1", "d_b1"), "d_w2", "d_b2",
               relu=True)                                             # (B, H)
    yp = ypred_ref[...].astype(f32)                                   # .float()
    yp = linear(yp, "fc1_w", "fc1_b", relu=True)                      # (B, 2H)
    yp = linear(yp, "fc2_w", "fc2_b", relu=True)                      # (B, H)

    # ---- fc3( cat([vitals, notes, demo, y_pred], dim=1) ) ------------------
    # One lane concat into a (B, 4H=128) tile, then ONE MXU push.
    x = jnp.concatenate([h, d, yp], axis=1)                           # (B, 4H)
    h1 = linear(x, "fc3_w1", "fc3_b1")                                # (B, 2H)
    out = linear(h1, "fc3_w2", "fc3_b2")                              # (B, 2)
    out_ref[...] = out.astype(out_ref.dtype)


# --------------------------------------------------------------------------
# Init-time weight packing
# --------------------------------------------------------------------------
def _scatter_gates(wm, H, stream):
    """Map a (R, 4H) PyTorch-ordered (i,f,g,o) gate matrix into the grouped,
    two-stream layout: columns [i_v i_n | f_v f_n | g_v g_n | o_v o_n].
    stream: 0 = vitals, 1 = notes."""
    out = jnp.zeros((wm.shape[0], 8 * H), wm.dtype)
    for g in range(4):
        dst = g * 2 * H + stream * H
        out = out.at[:, dst:dst + H].set(wm[:, g * H:(g + 1) * H])
    return out


def pack_params(p):
    """Pack all weights into one (8,128)-aligned f32 slab (one DMA).

    Also builds the block-diagonal dual-LSTM weights with grouped gate
    columns.  Run once at init time, NOT per forward call."""
    H = p["hidden_dim"]
    lane = max(128, _round_up(8 * H, 128))

    # Block-diagonal dual-LSTM weights (rows 0:H = vitals, H:2H = notes).
    w_in = jnp.concatenate([_scatter_gates(p["lv_wih"], H, 0),
                            _scatter_gates(p["ln_wih"], H, 1)], axis=0)  # (2H, 8H)
    w_r = jnp.concatenate([_scatter_gates(p["lv_whh"], H, 0),
                           _scatter_gates(p["ln_whh"], H, 1)], axis=0)   # (2H, 8H)
    b_bd = (_scatter_gates(p["lv_b"], H, 0)
            + _scatter_gates(p["ln_b"], H, 1))                           # (1, 8H)

    tensors = [
        ("v_w1", p["v_w1"]), ("v_b1", p["v_b1"]),
        ("v_w2", p["v_w2"]), ("v_b2", p["v_b2"]),
        ("n_w1", p["n_w1"]), ("n_b1", p["n_b1"]),
        ("n_w2", p["n_w2"]), ("n_b2", p["n_b2"]),
        ("d_w1", p["d_w1"]), ("d_b1", p["d_b1"]),
        ("d_w2", p["d_w2"]), ("d_b2", p["d_b2"]),
        ("lstm_win", w_in), ("lstm_wr", w_r), ("lstm_b", b_bd),
        ("fc1_w", p["fc1_w"]), ("fc1_b", p["fc1_b"]),
        ("fc2_w", p["fc2_w"]), ("fc2_b", p["fc2_b"]),
        ("fc3_w1", p["fc3_w1"]), ("fc3_b1", p["fc3_b1"]),
        ("fc3_w2", p["fc3_w2"]), ("fc3_b2", p["fc3_b2"]),
    ]

    offsets = {}
    blocks = []
    off = 0
    for name, arr in tensors:
        arr = arr.astype(jnp.float32)
        r, c = arr.shape
        rp = _round_up(r, 8)                      # sublane-tile-aligned start
        blk = jnp.zeros((rp, lane), jnp.float32).at[:r, :c].set(arr)
        offsets[name] = (off, r, c)
        blocks.append(blk)
        off += rp
    slab = jnp.concatenate(blocks, axis=0)        # (R_total, lane), ~0.6 MiB
    return {"slab": slab, "offsets": offsets, "H": H}


# --------------------------------------------------------------------------
# Wrapper
# --------------------------------------------------------------------------
def mortality_rate_forward(packed, vitals, notes, demo, y_pred):
    B, Tv, Fv = vitals.shape
    _, Tn, Fn = notes.shape
    H = packed["H"]
    # TODO(synk): the fused dual-LSTM recurrence assumes equal sequence
    # lengths; support Tv != Tn by running the shorter stream's tail alone.
    assert Tv == Tn, "fused dual-LSTM path requires Tv == Tn"
    T = Tv

    # Time-major ((t, b) row order): each unrolled step then reads a
    # contiguous (B, .) sublane slice instead of a strided row gather.
    vit_tm = jnp.transpose(vitals, (1, 0, 2)).reshape(T * B, Fv)
    not_tm = jnp.transpose(notes, (1, 0, 2)).reshape(T * B, Fn)

    kernel = functools.partial(mortality_kernel, offs=packed["offsets"],
                               B=B, T=T, H=H)
    vmem = pl.BlockSpec(memory_space=pltpu.MemorySpace.VMEM)
    return pl.pallas_call(
        kernel,
        out_shape=jax.ShapeDtypeStruct((B, 2), jnp.float32),
        in_specs=[vmem] * 5,
        out_specs=vmem,
    )(vit_tm, not_tm, demo, y_pred, packed["slab"])


# --------------------------------------------------------------------------
# Parameter initialization (deterministic, synthetic)
# --------------------------------------------------------------------------
def init_params(key, input_dim, hidden_dim, vitals_feature_dim, notes_emb_dim,
                demo_dim):
    H = hidden_dim
    names_shapes = {
        # vitals_lin: Linear(Fv, H//2), Linear(H//2, H)
        "v_w1": (vitals_feature_dim, H // 2), "v_b1": (1, H // 2),
        "v_w2": (H // 2, H), "v_b2": (1, H),
        # notes_lin: Linear(Fn, 2H), Linear(2H, H)
        "n_w1": (notes_emb_dim, 2 * H), "n_b1": (1, 2 * H),
        "n_w2": (2 * H, H), "n_b2": (1, H),
        # demo_lin: Linear(Fd, H//2), Linear(H//2, H)
        "d_w1": (demo_dim, H // 2), "d_b1": (1, H // 2),
        "d_w2": (H // 2, H), "d_b2": (1, H),
        # LSTM vitals / notes: input H -> hidden H, gate columns i, f, g, o.
        # l*_b represents the PyTorch sum b_ih + b_hh.
        "lv_wih": (H, 4 * H), "lv_whh": (H, 4 * H), "lv_b": (1, 4 * H),
        "ln_wih": (H, 4 * H), "ln_whh": (H, 4 * H), "ln_b": (1, 4 * H),
        # fc1 / fc2
        "fc1_w": (input_dim, 2 * H), "fc1_b": (1, 2 * H),
        "fc2_w": (2 * H, H), "fc2_b": (1, H),
        # fc3: Linear(4H, 2H), Linear(2H, 2)
        "fc3_w1": (4 * H, 2 * H), "fc3_b1": (1, 2 * H),
        "fc3_w2": (2 * H, 2), "fc3_b2": (1, 2),
    }
    params = {"hidden_dim": H}
    keys = jax.random.split(key, len(names_shapes))
    for k, (name, shape) in zip(keys, sorted(names_shapes.items())):
        params[name] = (0.1 * jax.random.normal(k, shape)).astype(jnp.float32)
    return params


if __name__ == "__main__":
    B = 2
    hidden_dim = 32
    input_dim = 8
    vitals_feature_dim = 12
    notes_emb_dim = 20
    demo_dim = 6
    Tv = 8
    Tn = 8

    key = jax.random.PRNGKey(0)
    k_param, k_v, k_n, k_d, k_y = jax.random.split(key, 5)

    params = init_params(k_param, input_dim, hidden_dim,
                         vitals_feature_dim, notes_emb_dim, demo_dim)
    packed = pack_params(params)   # one-time, init-side packing (single slab)

    vitals = jax.random.normal(k_v, (B, Tv, vitals_feature_dim), dtype=jnp.float32)
    notes = jax.random.normal(k_n, (B, Tn, notes_emb_dim), dtype=jnp.float32)
    demo = jax.random.normal(k_d, (B, demo_dim), dtype=jnp.float32)
    # y_pred arrives as non-float in the original module (it calls .float()).
    y_pred = jax.random.randint(k_y, (B, input_dim), minval=0, maxval=2,
                                dtype=jnp.int32)

    out = mortality_rate_forward(packed, vitals, notes, demo, y_pred)
    out = jax.block_until_ready(out)
    assert out.shape == (B, 2) and out.dtype == jnp.float32
    print("KERNEL_OK")
</pallas_src>

<mosaic_0001>
module attributes {stable_mosaic.version = 11 : i64} {
  func.func @mortality_kernel(%arg0: memref<16x12xf32, #tpu.memory_space<vmem>>, %arg1: memref<16x20xf32, #tpu.memory_space<vmem>>, %arg2: memref<2x6xf32, #tpu.memory_space<vmem>>, %arg3: memref<2x8xi32, #tpu.memory_space<vmem>>, %arg4: memref<624x256xf32, #tpu.memory_space<vmem>>, %arg5: memref<2x2xf32, #tpu.memory_space<vmem>>) attributes {dimension_semantics = [], scalar_prefetch = 0 : i64, scratch_operands = 0 : i64, tpu.core_type = #tpu.core_type<tc>} {
    %c0 = arith.constant 0 : index
    %c0_0 = arith.constant 0 : index
    %0 = vector.load %arg0[%c0, %c0_0] : memref<16x12xf32, #tpu.memory_space<vmem>>, vector<16x12xf32>
    %c0_1 = arith.constant 0 : index
    %c0_2 = arith.constant 0 : index
    %1 = vector.load %arg4[%c0_1, %c0_2] : memref<624x256xf32, #tpu.memory_space<vmem>>, vector<12x16xf32>
    %cst = arith.constant dense<0.000000e+00> : vector<16x16xf32>
    %2 = tpu.matmul %0, %1, %cst {dimension_numbers = #tpu.dot_dimension_numbers<[1], [0], [0], [1], [0, 0, 1, 1], [], []>} : vector<16x12xf32>, vector<12x16xf32>, vector<16x16xf32> -> vector<16x16xf32>
    %c16 = arith.constant 16 : index
    %c0_3 = arith.constant 0 : index
    %3 = vector.load %arg4[%c16, %c0_3] : memref<624x256xf32, #tpu.memory_space<vmem>>, vector<1x16xf32>
    %4 = vector.broadcast %3 : vector<1x16xf32> to vector<16x16xf32>
    %5 = arith.addf %2, %4 : vector<16x16xf32>
    %c24 = arith.constant 24 : index
    %c0_4 = arith.constant 0 : index
    %6 = vector.load %arg4[%c24, %c0_4] : memref<624x256xf32, #tpu.memory_space<vmem>>, vector<16x32xf32>
    %cst_5 = arith.constant dense<0.000000e+00> : vector<16x32xf32>
    %7 = tpu.matmul %5, %6, %cst_5 {dimension_numbers = #tpu.dot_dimension_numbers<[1], [0], [0], [1], [0, 0, 1, 1], [], []>} : vector<16x16xf32>, vector<16x32xf32>, vector<16x32xf32> -> vector<16x32xf32>
    %c40 = arith.constant 40 : index
    %c0_6 = arith.constant 0 : index
    %8 = vector.load %arg4[%c40, %c0_6] : memref<624x256xf32, #tpu.memory_space<vmem>>, vector<1x32xf32>
    %9 = vector.broadcast %8 : vector<1x32xf32> to vector<16x32xf32>
    %10 = arith.addf %7, %9 : vector<16x32xf32>
    %cst_7 = arith.constant 0.000000e+00 : f32
    %11 = vector.broadcast %cst_7 : f32 to vector<16x32xf32>
    %12 = arith.maximumf %10, %11 : vector<16x32xf32>
    %c0_8 = arith.constant 0 : index
    %c0_9 = arith.constant 0 : index
    %13 = vector.load %arg1[%c0_8, %c0_9] : memref<16x20xf32, #tpu.memory_space<vmem>>, vector<16x20xf32>
    %c48 = arith.constant 48 : index
    %c0_10 = arith.constant 0 : index
    %14 = vector.load %arg4[%c48, %c0_10] : memref<624x256xf32, #tpu.memory_space<vmem>>, vector<20x64xf32>
    %cst_11 = arith.constant dense<0.000000e+00> : vector<16x64xf32>
    %15 = tpu.matmul %13, %14, %cst_11 {dimension_numbers = #tpu.dot_dimension_numbers<[1], [0], [0], [1], [0, 0, 1, 1], [], []>} : vector<16x20xf32>, vector<20x64xf32>, vector<16x64xf32> -> vector<16x64xf32>
    %c72 = arith.constant 72 : index
    %c0_12 = arith.constant 0 : index
    %16 = vector.load %arg4[%c72, %c0_12] : memref<624x256xf32, #tpu.memory_space<vmem>>, vector<1x64xf32>
    %17 = vector.broadcast %16 : vector<1x64xf32> to vector<16x64xf32>
    %18 = arith.addf %15, %17 : vector<16x64xf32>
    %c80 = arith.constant 80 : index
    %c0_13 = arith.constant 0 : index
    %19 = vector.load %arg4[%c80, %c0_13] : memref<624x256xf32, #tpu.memory_space<vmem>>, vector<64x32xf32>
    %cst_14 = arith.constant dense<0.000000e+00> : vector<16x32xf32>
    %20 = tpu.matmul %18, %19, %cst_14 {dimension_numbers = #tpu.dot_dimension_numbers<[1], [0], [0], [1], [0, 0, 1, 1], [], []>} : vector<16x64xf32>, vector<64x32xf32>, vector<16x32xf32> -> vector<16x32xf32>
    %c144 = arith.constant 144 : index
    %c0_15 = arith.constant 0 : index
    %21 = vector.load %arg4[%c144, %c0_15] : memref<624x256xf32, #tpu.memory_space<vmem>>, vector<1x32xf32>
    %22 = vector.broadcast %21 : vector<1x32xf32> to vector<16x32xf32>
    %23 = arith.addf %20, %22 : vector<16x32xf32>
    %cst_16 = arith.constant 0.000000e+00 : f32
    %24 = vector.broadcast %cst_16 : f32 to vector<16x32xf32>
    %25 = arith.maximumf %23, %24 : vector<16x32xf32>
    %26 = tpu.concatenate %12, %25 in 1 : vector<16x32xf32>, vector<16x32xf32> -> vector<16x64xf32>
    %c192 = arith.constant 192 : index
    %c0_17 = arith.constant 0 : index
    %27 = vector.load %arg4[%c192, %c0_17] : memref<624x256xf32, #tpu.memory_space<vmem>>, vector<64x256xf32>
    %cst_18 = arith.constant dense<0.000000e+00> : vector<16x256xf32>
    %28 = tpu.matmul %26, %27, %cst_18 {dimension_numbers = #tpu.dot_dimension_numbers<[1], [0], [0], [1], [0, 0, 1, 1], [], []>} : vector<16x64xf32>, vector<64x256xf32>, vector<16x256xf32> -> vector<16x256xf32>
    %c320 = arith.constant 320 : index
    %c0_19 = arith.constant 0 : index
    %29 = vector.load %arg4[%c320, %c0_19] : memref<624x256xf32, #tpu.memory_space<vmem>>, vector<1x256xf32>
    %30 = vector.broadcast %29 : vector<1x256xf32> to vector<16x256xf32>
    %31 = arith.addf %28, %30 : vector<16x256xf32>
    %c256 = arith.constant 256 : index
    %c0_20 = arith.constant 0 : index
    %32 = vector.load %arg4[%c256, %c0_20] : memref<624x256xf32, #tpu.memory_space<vmem>>, vector<64x256xf32>
    %cst_21 = arith.constant 0.000000e+00 : f32
    %33 = vector.broadcast %cst_21 : f32 to vector<2x64xf32>
    %cst_22 = arith.constant 0.000000e+00 : f32
    %34 = vector.broadcast %cst_22 : f32 to vector<2x64xf32>
    %35 = vector.extract_strided_slice %31 {offsets = [0, 0], sizes = [2, 256], strides = [1, 1]} : vector<16x256xf32> to vector<2x256xf32>
    %cst_23 = arith.constant dense<0.000000e+00> : vector<2x256xf32>
    %36 = tpu.matmul %33, %32, %cst_23 {dimension_numbers = #tpu.dot_dimension_numbers<[1], [0], [0], [1], [0, 0, 1, 1], [], []>} : vector<2x64xf32>, vector<64x256xf32>, vector<2x256xf32> -> vector<2x256xf32>
    %37 = arith.addf %35, %36 : vector<2x256xf32>
    %38 = vector.extract_strided_slice %37 {offsets = [0, 0], sizes = [2, 64], strides = [1, 1]} : vector<2x256xf32> to vector<2x64xf32>
    %39 = arith.negf %38 : vector<2x64xf32>
    %40 = math.exp %39 : vector<2x64xf32>
    %cst_24 = arith.constant 1.000000e+00 : f32
    %41 = vector.broadcast %cst_24 : f32 to vector<2x64xf32>
    %42 = arith.addf %41, %40 : vector<2x64xf32>
    %43 = arith.divf %41, %42 : vector<2x64xf32>
    %44 = vector.extract_strided_slice %37 {offsets = [0, 64], sizes = [2, 64], strides = [1, 1]} : vector<2x256xf32> to vector<2x64xf32>
    %45 = arith.negf %44 : vector<2x64xf32>
    %46 = math.exp %45 : vector<2x64xf32>
    %cst_25 = arith.constant 1.000000e+00 : f32
    %47 = vector.broadcast %cst_25 : f32 to vector<2x64xf32>
    %48 = arith.addf %47, %46 : vector<2x64xf32>
    %49 = arith.divf %47, %48 : vector<2x64xf32>
    %50 = vector.extract_strided_slice %37 {offsets = [0, 128], sizes = [2, 64], strides = [1, 1]} : vector<2x256xf32> to vector<2x64xf32>
    %51 = math.tanh %50 : vector<2x64xf32>
    %52 = vector.extract_strided_slice %37 {offsets = [0, 192], sizes = [2, 64], strides = [1, 1]} : vector<2x256xf32> to vector<2x64xf32>
    %53 = arith.negf %52 : vector<2x64xf32>
    %54 = math.exp %53 : vector<2x64xf32>
    %cst_26 = arith.constant 1.000000e+00 : f32
    %55 = vector.broadcast %cst_26 : f32 to vector<2x64xf32>
    %56 = arith.addf %55, %54 : vector<2x64xf32>
    %57 = arith.divf %55, %56 : vector<2x64xf32>
    %58 = arith.mulf %49, %34 : vector<2x64xf32>
    %59 = arith.mulf %43, %51 : vector<2x64xf32>
    %60 = arith.addf %58, %59 : vector<2x64xf32>
    %61 = math.tanh %60 : vector<2x64xf32>
    %62 = arith.mulf %57, %61 : vector<2x64xf32>
    %63 = vector.extract_strided_slice %31 {offsets = [2, 0], sizes = [2, 256], strides = [1, 1]} : vector<16x256xf32> to vector<2x256xf32>
    %cst_27 = arith.constant dense<0.000000e+00> : vector<2x256xf32>
    %64 = tpu.matmul %62, %32, %cst_27 {dimension_numbers = #tpu.dot_dimension_numbers<[1], [0], [0], [1], [0, 0, 1, 1], [], []>} : vector<2x64xf32>, vector<64x256xf32>, vector<2x256xf32> -> vector<2x256xf32>
    %65 = arith.addf %63, %64 : vector<2x256xf32>
    %66 = vector.extract_strided_slice %65 {offsets = [0, 0], sizes = [2, 64], strides = [1, 1]} : vector<2x256xf32> to vector<2x64xf32>
    %67 = arith.negf %66 : vector<2x64xf32>
    %68 = math.exp %67 : vector<2x64xf32>
    %cst_28 = arith.constant 1.000000e+00 : f32
    %69 = vector.broadcast %cst_28 : f32 to vector<2x64xf32>
    %70 = arith.addf %69, %68 : vector<2x64xf32>
    %71 = arith.divf %69, %70 : vector<2x64xf32>
    %72 = vector.extract_strided_slice %65 {offsets = [0, 64], sizes = [2, 64], strides = [1, 1]} : vector<2x256xf32> to vector<2x64xf32>
    %73 = arith.negf %72 : vector<2x64xf32>
    %74 = math.exp %73 : vector<2x64xf32>
    %cst_29 = arith.constant 1.000000e+00 : f32
    %75 = vector.broadcast %cst_29 : f32 to vector<2x64xf32>
    %76 = arith.addf %75, %74 : vector<2x64xf32>
    %77 = arith.divf %75, %76 : vector<2x64xf32>
    %78 = vector.extract_strided_slice %65 {offsets = [0, 128], sizes = [2, 64], strides = [1, 1]} : vector<2x256xf32> to vector<2x64xf32>
    %79 = math.tanh %78 : vector<2x64xf32>
    %80 = vector.extract_strided_slice %65 {offsets = [0, 192], sizes = [2, 64], strides = [1, 1]} : vector<2x256xf32> to vector<2x64xf32>
    %81 = arith.negf %80 : vector<2x64xf32>
    %82 = math.exp %81 : vector<2x64xf32>
    %cst_30 = arith.constant 1.000000e+00 : f32
    %83 = vector.broadcast %cst_30 : f32 to vector<2x64xf32>
    %84 = arith.addf %83, %82 : vector<2x64xf32>
    %85 = arith.divf %83, %84 : vector<2x64xf32>
    %86 = arith.mulf %77, %60 : vector<2x64xf32>
    %87 = arith.mulf %71, %79 : vector<2x64xf32>
    %88 = arith.addf %86, %87 : vector<2x64xf32>
    %89 = math.tanh %88 : vector<2x64xf32>
    %90 = arith.mulf %85, %89 : vector<2x64xf32>
    %91 = vector.extract_strided_slice %31 {offsets = [4, 0], sizes = [2, 256], strides = [1, 1]} : vector<16x256xf32> to vector<2x256xf32>
    %cst_31 = arith.constant dense<0.000000e+00> : vector<2x256xf32>
    %92 = tpu.matmul %90, %32, %cst_31 {dimension_numbers = #tpu.dot_dimension_numbers<[1], [0], [0], [1], [0, 0, 1, 1], [], []>} : vector<2x64xf32>, vector<64x256xf32>, vector<2x256xf32> -> vector<2x256xf32>
    %93 = arith.addf %91, %92 : vector<2x256xf32>
    %94 = vector.extract_strided_slice %93 {offsets = [0, 0], sizes = [2, 64], strides = [1, 1]} : vector<2x256xf32> to vector<2x64xf32>
    %95 = arith.negf %94 : vector<2x64xf32>
    %96 = math.exp %95 : vector<2x64xf32>
    %cst_32 = arith.constant 1.000000e+00 : f32
    %97 = vector.broadcast %cst_32 : f32 to vector<2x64xf32>
    %98 = arith.addf %97, %96 : vector<2x64xf32>
    %99 = arith.divf %97, %98 : vector<2x64xf32>
    %100 = vector.extract_strided_slice %93 {offsets = [0, 64], sizes = [2, 64], strides = [1, 1]} : vector<2x256xf32> to vector<2x64xf32>
    %101 = arith.negf %100 : vector<2x64xf32>
    %102 = math.exp %101 : vector<2x64xf32>
    %cst_33 = arith.constant 1.000000e+00 : f32
    %103 = vector.broadcast %cst_33 : f32 to vector<2x64xf32>
    %104 = arith.addf %103, %102 : vector<2x64xf32>
    %105 = arith.divf %103, %104 : vector<2x64xf32>
    %106 = vector.extract_strided_slice %93 {offsets = [0, 128], sizes = [2, 64], strides = [1, 1]} : vector<2x256xf32> to vector<2x64xf32>
    %107 = math.tanh %106 : vector<2x64xf32>
    %108 = vector.extract_strided_slice %93 {offsets = [0, 192], sizes = [2, 64], strides = [1, 1]} : vector<2x256xf32> to vector<2x64xf32>
    %109 = arith.negf %108 : vector<2x64xf32>
    %110 = math.exp %109 : vector<2x64xf32>
    %cst_34 = arith.constant 1.000000e+00 : f32
    %111 = vector.broadcast %cst_34 : f32 to vector<2x64xf32>
    %112 = arith.addf %111, %110 : vector<2x64xf32>
    %113 = arith.divf %111, %112 : vector<2x64xf32>
    %114 = arith.mulf %105, %88 : vector<2x64xf32>
    %115 = arith.mulf %99, %107 : vector<2x64xf32>
    %116 = arith.addf %114, %115 : vector<2x64xf32>
    %117 = math.tanh %116 : vector<2x64xf32>
    %118 = arith.mulf %113, %117 : vector<2x64xf32>
    %119 = vector.extract_strided_slice %31 {offsets = [6, 0], sizes = [2, 256], strides = [1, 1]} : vector<16x256xf32> to vector<2x256xf32>
    %cst_35 = arith.constant dense<0.000000e+00> : vector<2x256xf32>
    %120 = tpu.matmul %118, %32, %cst_35 {dimension_numbers = #tpu.dot_dimension_numbers<[1], [0], [0], [1], [0, 0, 1, 1], [], []>} : vector<2x64xf32>, vector<64x256xf32>, vector<2x256xf32> -> vector<2x256xf32>
    %121 = arith.addf %119, %120 : vector<2x256xf32>
    %122 = vector.extract_strided_slice %121 {offsets = [0, 0], sizes = [2, 64], strides = [1, 1]} : vector<2x256xf32> to vector<2x64xf32>
    %123 = arith.negf %122 : vector<2x64xf32>
    %124 = math.exp %123 : vector<2x64xf32>
    %cst_36 = arith.constant 1.000000e+00 : f32
    %125 = vector.broadcast %cst_36 : f32 to vector<2x64xf32>
    %126 = arith.addf %125, %124 : vector<2x64xf32>
    %127 = arith.divf %125, %126 : vector<2x64xf32>
    %128 = vector.extract_strided_slice %121 {offsets = [0, 64], sizes = [2, 64], strides = [1, 1]} : vector<2x256xf32> to vector<2x64xf32>
    %129 = arith.negf %128 : vector<2x64xf32>
    %130 = math.exp %129 : vector<2x64xf32>
    %cst_37 = arith.constant 1.000000e+00 : f32
    %131 = vector.broadcast %cst_37 : f32 to vector<2x64xf32>
    %132 = arith.addf %131, %130 : vector<2x64xf32>
    %133 = arith.divf %131, %132 : vector<2x64xf32>
    %134 = vector.extract_strided_slice %121 {offsets = [0, 128], sizes = [2, 64], strides = [1, 1]} : vector<2x256xf32> to vector<2x64xf32>
    %135 = math.tanh %134 : vector<2x64xf32>
    %136 = vector.extract_strided_slice %121 {offsets = [0, 192], sizes = [2, 64], strides = [1, 1]} : vector<2x256xf32> to vector<2x64xf32>
    %137 = arith.negf %136 : vector<2x64xf32>
    %138 = math.exp %137 : vector<2x64xf32>
    %cst_38 = arith.constant 1.000000e+00 : f32
    %139 = vector.broadcast %cst_38 : f32 to vector<2x64xf32>
    %140 = arith.addf %139, %138 : vector<2x64xf32>
    %141 = arith.divf %139, %140 : vector<2x64xf32>
    %142 = arith.mulf %133, %116 : vector<2x64xf32>
    %143 = arith.mulf %127, %135 : vector<2x64xf32>
    %144 = arith.addf %142, %143 : vector<2x64xf32>
    %145 = math.tanh %144 : vector<2x64xf32>
    %146 = arith.mulf %141, %145 : vector<2x64xf32>
    %147 = vector.extract_strided_slice %31 {offsets = [8, 0], sizes = [2, 256], strides = [1, 1]} : vector<16x256xf32> to vector<2x256xf32>
    %cst_39 = arith.constant dense<0.000000e+00> : vector<2x256xf32>
    %148 = tpu.matmul %146, %32, %cst_39 {dimension_numbers = #tpu.dot_dimension_numbers<[1], [0], [0], [1], [0, 0, 1, 1], [], []>} : vector<2x64xf32>, vector<64x256xf32>, vector<2x256xf32> -> vector<2x256xf32>
    %149 = arith.addf %147, %148 : vector<2x256xf32>
    %150 = vector.extract_strided_slice %149 {offsets = [0, 0], sizes = [2, 64], strides = [1, 1]} : vector<2x256xf32> to vector<2x64xf32>
    %151 = arith.negf %150 : vector<2x64xf32>
    %152 = math.exp %151 : vector<2x64xf32>
    %cst_40 = arith.constant 1.000000e+00 : f32
    %153 = vector.broadcast %cst_40 : f32 to vector<2x64xf32>
    %154 = arith.addf %153, %152 : vector<2x64xf32>
    %155 = arith.divf %153, %154 : vector<2x64xf32>
    %156 = vector.extract_strided_slice %149 {offsets = [0, 64], sizes = [2, 64], strides = [1, 1]} : vector<2x256xf32> to vector<2x64xf32>
    %157 = arith.negf %156 : vector<2x64xf32>
    %158 = math.exp %157 : vector<2x64xf32>
    %cst_41 = arith.constant 1.000000e+00 : f32
    %159 = vector.broadcast %cst_41 : f32 to vector<2x64xf32>
    %160 = arith.addf %159, %158 : vector<2x64xf32>
    %161 = arith.divf %159, %160 : vector<2x64xf32>
    %162 = vector.extract_strided_slice %149 {offsets = [0, 128], sizes = [2, 64], strides = [1, 1]} : vector<2x256xf32> to vector<2x64xf32>
    %163 = math.tanh %162 : vector<2x64xf32>
    %164 = vector.extract_strided_slice %149 {offsets = [0, 192], sizes = [2, 64], strides = [1, 1]} : vector<2x256xf32> to vector<2x64xf32>
    %165 = arith.negf %164 : vector<2x64xf32>
    %166 = math.exp %165 : vector<2x64xf32>
    %cst_42 = arith.constant 1.000000e+00 : f32
    %167 = vector.broadcast %cst_42 : f32 to vector<2x64xf32>
    %168 = arith.addf %167, %166 : vector<2x64xf32>
    %169 = arith.divf %167, %168 : vector<2x64xf32>
    %170 = arith.mulf %161, %144 : vector<2x64xf32>
    %171 = arith.mulf %155, %163 : vector<2x64xf32>
    %172 = arith.addf %170, %171 : vector<2x64xf32>
    %173 = math.tanh %172 : vector<2x64xf32>
    %174 = arith.mulf %169, %173 : vector<2x64xf32>
    %175 = vector.extract_strided_slice %31 {offsets = [10, 0], sizes = [2, 256], strides = [1, 1]} : vector<16x256xf32> to vector<2x256xf32>
    %cst_43 = arith.constant dense<0.000000e+00> : vector<2x256xf32>
    %176 = tpu.matmul %174, %32, %cst_43 {dimension_numbers = #tpu.dot_dimension_numbers<[1], [0], [0], [1], [0, 0, 1, 1], [], []>} : vector<2x64xf32>, vector<64x256xf32>, vector<2x256xf32> -> vector<2x256xf32>
    %177 = arith.addf %175, %176 : vector<2x256xf32>
    %178 = vector.extract_strided_slice %177 {offsets = [0, 0], sizes = [2, 64], strides = [1, 1]} : vector<2x256xf32> to vector<2x64xf32>
    %179 = arith.negf %178 : vector<2x64xf32>
    %180 = math.exp %179 : vector<2x64xf32>
    %cst_44 = arith.constant 1.000000e+00 : f32
    %181 = vector.broadcast %cst_44 : f32 to vector<2x64xf32>
    %182 = arith.addf %181, %180 : vector<2x64xf32>
    %183 = arith.divf %181, %182 : vector<2x64xf32>
    %184 = vector.extract_strided_slice %177 {offsets = [0, 64], sizes = [2, 64], strides = [1, 1]} : vector<2x256xf32> to vector<2x64xf32>
    %185 = arith.negf %184 : vector<2x64xf32>
    %186 = math.exp %185 : vector<2x64xf32>
    %cst_45 = arith.constant 1.000000e+00 : f32
    %187 = vector.broadcast %cst_45 : f32 to vector<2x64xf32>
    %188 = arith.addf %187, %186 : vector<2x64xf32>
    %189 = arith.divf %187, %188 : vector<2x64xf32>
    %190 = vector.extract_strided_slice %177 {offsets = [0, 128], sizes = [2, 64], strides = [1, 1]} : vector<2x256xf32> to vector<2x64xf32>
    %191 = math.tanh %190 : vector<2x64xf32>
    %192 = vector.extract_strided_slice %177 {offsets = [0, 192], sizes = [2, 64], strides = [1, 1]} : vector<2x256xf32> to vector<2x64xf32>
    %193 = arith.negf %192 : vector<2x64xf32>
    %194 = math.exp %193 : vector<2x64xf32>
    %cst_46 = arith.constant 1.000000e+00 : f32
    %195 = vector.broadcast %cst_46 : f32 to vector<2x64xf32>
    %196 = arith.addf %195, %194 : vector<2x64xf32>
    %197 = arith.divf %195, %196 : vector<2x64xf32>
    %198 = arith.mulf %189, %172 : vector<2x64xf32>
    %199 = arith.mulf %183, %191 : vector<2x64xf32>
    %200 = arith.addf %198, %199 : vector<2x64xf32>
    %201 = math.tanh %200 : vector<2x64xf32>
    %202 = arith.mulf %197, %201 : vector<2x64xf32>
    %203 = vector.extract_strided_slice %31 {offsets = [12, 0], sizes = [2, 256], strides = [1, 1]} : vector<16x256xf32> to vector<2x256xf32>
    %cst_47 = arith.constant dense<0.000000e+00> : vector<2x256xf32>
    %204 = tpu.matmul %202, %32, %cst_47 {dimension_numbers = #tpu.dot_dimension_numbers<[1], [0], [0], [1], [0, 0, 1, 1], [], []>} : vector<2x64xf32>, vector<64x256xf32>, vector<2x256xf32> -> vector<2x256xf32>
    %205 = arith.addf %203, %204 : vector<2x256xf32>
    %206 = vector.extract_strided_slice %205 {offsets = [0, 0], sizes = [2, 64], strides = [1, 1]} : vector<2x256xf32> to vector<2x64xf32>
    %207 = arith.negf %206 : vector<2x64xf32>
    %208 = math.exp %207 : vector<2x64xf32>
    %cst_48 = arith.constant 1.000000e+00 : f32
    %209 = vector.broadcast %cst_48 : f32 to vector<2x64xf32>
    %210 = arith.addf %209, %208 : vector<2x64xf32>
    %211 = arith.divf %209, %210 : vector<2x64xf32>
    %212 = vector.extract_strided_slice %205 {offsets = [0, 64], sizes = [2, 64], strides = [1, 1]} : vector<2x256xf32> to vector<2x64xf32>
    %213 = arith.negf %212 : vector<2x64xf32>
    %214 = math.exp %213 : vector<2x64xf32>
    %cst_49 = arith.constant 1.000000e+00 : f32
    %215 = vector.broadcast %cst_49 : f32 to vector<2x64xf32>
    %216 = arith.addf %215, %214 : vector<2x64xf32>
    %217 = arith.divf %215, %216 : vector<2x64xf32>
    %218 = vector.extract_strided_slice %205 {offsets = [0, 128], sizes = [2, 64], strides = [1, 1]} : vector<2x256xf32> to vector<2x64xf32>
    %219 = math.tanh %218 : vector<2x64xf32>
    %220 = vector.extract_strided_slice %205 {offsets = [0, 192], sizes = [2, 64], strides = [1, 1]} : vector<2x256xf32> to vector<2x64xf32>
    %221 = arith.negf %220 : vector<2x64xf32>
    %222 = math.exp %221 : vector<2x64xf32>
    %cst_50 = arith.constant 1.000000e+00 : f32
    %223 = vector.broadcast %cst_50 : f32 to vector<2x64xf32>
    %224 = arith.addf %223, %222 : vector<2x64xf32>
    %225 = arith.divf %223, %224 : vector<2x64xf32>
    %226 = arith.mulf %217, %200 : vector<2x64xf32>
    %227 = arith.mulf %211, %219 : vector<2x64xf32>
    %228 = arith.addf %226, %227 : vector<2x64xf32>
    %229 = math.tanh %228 : vector<2x64xf32>
    %230 = arith.mulf %225, %229 : vector<2x64xf32>
    %231 = vector.extract_strided_slice %31 {offsets = [14, 0], sizes = [2, 256], strides = [1, 1]} : vector<16x256xf32> to vector<2x256xf32>
    %cst_51 = arith.constant dense<0.000000e+00> : vector<2x256xf32>
    %232 = tpu.matmul %230, %32, %cst_51 {dimension_numbers = #tpu.dot_dimension_numbers<[1], [0], [0], [1], [0, 0, 1, 1], [], []>} : vector<2x64xf32>, vector<64x256xf32>, vector<2x256xf32> -> vector<2x256xf32>
    %233 = arith.addf %231, %232 : vector<2x256xf32>
    %234 = vector.extract_strided_slice %233 {offsets = [0, 0], sizes = [2, 64], strides = [1, 1]} : vector<2x256xf32> to vector<2x64xf32>
    %235 = arith.negf %234 : vector<2x64xf32>
    %236 = math.exp %235 : vector<2x64xf32>
    %cst_52 = arith.constant 1.000000e+00 : f32
    %237 = vector.broadcast %cst_52 : f32 to vector<2x64xf32>
    %238 = arith.addf %237, %236 : vector<2x64xf32>
    %239 = arith.divf %237, %238 : vector<2x64xf32>
    %240 = vector.extract_strided_slice %233 {offsets = [0, 64], sizes = [2, 64], strides = [1, 1]} : vector<2x256xf32> to vector<2x64xf32>
    %241 = arith.negf %240 : vector<2x64xf32>
    %242 = math.exp %241 : vector<2x64xf32>
    %cst_53 = arith.constant 1.000000e+00 : f32
    %243 = vector.broadcast %cst_53 : f32 to vector<2x64xf32>
    %244 = arith.addf %243, %242 : vector<2x64xf32>
    %245 = arith.divf %243, %244 : vector<2x64xf32>
    %246 = vector.extract_strided_slice %233 {offsets = [0, 128], sizes = [2, 64], strides = [1, 1]} : vector<2x256xf32> to vector<2x64xf32>
    %247 = math.tanh %246 : vector<2x64xf32>
    %248 = vector.extract_strided_slice %233 {offsets = [0, 192], sizes = [2, 64], strides = [1, 1]} : vector<2x256xf32> to vector<2x64xf32>
    %249 = arith.negf %248 : vector<2x64xf32>
    %250 = math.exp %249 : vector<2x64xf32>
    %cst_54 = arith.constant 1.000000e+00 : f32
    %251 = vector.broadcast %cst_54 : f32 to vector<2x64xf32>
    %252 = arith.addf %251, %250 : vector<2x64xf32>
    %253 = arith.divf %251, %252 : vector<2x64xf32>
    %254 = arith.mulf %245, %228 : vector<2x64xf32>
    %255 = arith.mulf %239, %247 : vector<2x64xf32>
    %256 = arith.addf %254, %255 : vector<2x64xf32>
    %257 = math.tanh %256 : vector<2x64xf32>
    %258 = arith.mulf %253, %257 : vector<2x64xf32>
    %c0_55 = arith.constant 0 : index
    %c0_56 = arith.constant 0 : index
    %259 = vector.load %arg2[%c0_55, %c0_56] : memref<2x6xf32, #tpu.memory_space<vmem>>, vector<2x6xf32>
    %c152 = arith.constant 152 : index
    %c0_57 = arith.constant 0 : index
    %260 = vector.load %arg4[%c152, %c0_57] : memref<624x256xf32, #tpu.memory_space<vmem>>, vector<6x16xf32>
    %cst_58 = arith.constant dense<0.000000e+00> : vector<2x16xf32>
    %261 = tpu.matmul %259, %260, %cst_58 {dimension_numbers = #tpu.dot_dimension_numbers<[1], [0], [0], [1], [0, 0, 1, 1], [], []>} : vector<2x6xf32>, vector<6x16xf32>, vector<2x16xf32> -> vector<2x16xf32>
    %c160 = arith.constant 160 : index
    %c0_59 = arith.constant 0 : index
    %262 = vector.load %arg4[%c160, %c0_59] : memref<624x256xf32, #tpu.memory_space<vmem>>, vector<1x16xf32>
    %263 = vector.broadcast %262 : vector<1x16xf32> to vector<2x16xf32>
    %264 = arith.addf %261, %263 : vector<2x16xf32>
    %c168 = arith.constant 168 : index
    %c0_60 = arith.constant 0 : index
    %265 = vector.load %arg4[%c168, %c0_60] : memref<624x256xf32, #tpu.memory_space<vmem>>, vector<16x32xf32>
    %cst_61 = arith.constant dense<0.000000e+00> : vector<2x32xf32>
    %266 = tpu.matmul %264, %265, %cst_61 {dimension_numbers = #tpu.dot_dimension_numbers<[1], [0], [0], [1], [0, 0, 1, 1], [], []>} : vector<2x16xf32>, vector<16x32xf32>, vector<2x32xf32> -> vector<2x32xf32>
    %c184 = arith.constant 184 : index
    %c0_62 = arith.constant 0 : index
    %267 = vector.load %arg4[%c184, %c0_62] : memref<624x256xf32, #tpu.memory_space<vmem>>, vector<1x32xf32>
    %268 = vector.broadcast %267 : vector<1x32xf32> to vector<2x32xf32>
    %269 = arith.addf %266, %268 : vector<2x32xf32>
    %cst_63 = arith.constant 0.000000e+00 : f32
    %270 = vector.broadcast %cst_63 : f32 to vector<2x32xf32>
    %271 = arith.maximumf %269, %270 : vector<2x32xf32>
    %c0_64 = arith.constant 0 : index
    %c0_65 = arith.constant 0 : index
    %272 = vector.load %arg3[%c0_64, %c0_65] : memref<2x8xi32, #tpu.memory_space<vmem>>, vector<2x8xi32>
    %273 = arith.sitofp %272 : vector<2x8xi32> to vector<2x8xf32>
    %c328 = arith.constant 328 : index
    %c0_66 = arith.constant 0 : index
    %274 = vector.load %arg4[%c328, %c0_66] : memref<624x256xf32, #tpu.memory_space<vmem>>, vector<8x64xf32>
    %cst_67 = arith.constant dense<0.000000e+00> : vector<2x64xf32>
    %275 = tpu.matmul %273, %274, %cst_67 {dimension_numbers = #tpu.dot_dimension_numbers<[1], [0], [0], [1], [0, 0, 1, 1], [], []>} : vector<2x8xf32>, vector<8x64xf32>, vector<2x64xf32> -> vector<2x64xf32>
    %c336 = arith.constant 336 : index
    %c0_68 = arith.constant 0 : index
    %276 = vector.load %arg4[%c336, %c0_68] : memref<624x256xf32, #tpu.memory_space<vmem>>, vector<1x64xf32>
    %277 = vector.broadcast %276 : vector<1x64xf32> to vector<2x64xf32>
    %278 = arith.addf %275, %277 : vector<2x64xf32>
    %cst_69 = arith.constant 0.000000e+00 : f32
    %279 = vector.broadcast %cst_69 : f32 to vector<2x64xf32>
    %280 = arith.maximumf %278, %279 : vector<2x64xf32>
    %c344 = arith.constant 344 : index
    %c0_70 = arith.constant 0 : index
    %281 = vector.load %arg4[%c344, %c0_70] : memref<624x256xf32, #tpu.memory_space<vmem>>, vector<64x32xf32>
    %cst_71 = arith.constant dense<0.000000e+00> : vector<2x32xf32>
    %282 = tpu.matmul %280, %281, %cst_71 {dimension_numbers = #tpu.dot_dimension_numbers<[1], [0], [0], [1], [0, 0, 1, 1], [], []>} : vector<2x64xf32>, vector<64x32xf32>, vector<2x32xf32> -> vector<2x32xf32>
    %c408 = arith.constant 408 : index
    %c0_72 = arith.constant 0 : index
    %283 = vector.load %arg4[%c408, %c0_72] : memref<624x256xf32, #tpu.memory_space<vmem>>, vector<1x32xf32>
    %284 = vector.broadcast %283 : vector<1x32xf32> to vector<2x32xf32>
    %285 = arith.addf %282, %284 : vector<2x32xf32>
    %cst_73 = arith.constant 0.000000e+00 : f32
    %286 = vector.broadcast %cst_73 : f32 to vector<2x32xf32>
    %287 = arith.maximumf %285, %286 : vector<2x32xf32>
    %288 = tpu.concatenate %258, %271, %287 in 1 : vector<2x64xf32>, vector<2x32xf32>, vector<2x32xf32> -> vector<2x128xf32>
    %c416 = arith.constant 416 : index
    %c0_74 = arith.constant 0 : index
    %289 = vector.load %arg4[%c416, %c0_74] : memref<624x256xf32, #tpu.memory_space<vmem>>, vector<128x64xf32>
    %cst_75 = arith.constant dense<0.000000e+00> : vector<2x64xf32>
    %290 = tpu.matmul %288, %289, %cst_75 {dimension_numbers = #tpu.dot_dimension_numbers<[1], [0], [0], [1], [0, 0, 1, 1], [], []>} : vector<2x128xf32>, vector<128x64xf32>, vector<2x64xf32> -> vector<2x64xf32>
    %c544 = arith.constant 544 : index
    %c0_76 = arith.constant 0 : index
    %291 = vector.load %arg4[%c544, %c0_76] : memref<624x256xf32, #tpu.memory_space<vmem>>, vector<1x64xf32>
    %292 = vector.broadcast %291 : vector<1x64xf32> to vector<2x64xf32>
    %293 = arith.addf %290, %292 : vector<2x64xf32>
    %c552 = arith.constant 552 : index
    %c0_77 = arith.constant 0 : index
    %294 = vector.load %arg4[%c552, %c0_77] : memref<624x256xf32, #tpu.memory_space<vmem>>, vector<64x2xf32>
    %cst_78 = arith.constant dense<0.000000e+00> : vector<2x2xf32>
    %295 = tpu.matmul %293, %294, %cst_78 {dimension_numbers = #tpu.dot_dimension_numbers<[1], [0], [0], [1], [0, 0, 1, 1], [], []>} : vector<2x64xf32>, vector<64x2xf32>, vector<2x2xf32> -> vector<2x2xf32>
    %c616 = arith.constant 616 : index
    %c0_79 = arith.constant 0 : index
    %296 = vector.load %arg4[%c616, %c0_79] : memref<624x256xf32, #tpu.memory_space<vmem>>, vector<1x2xf32>
    %297 = vector.broadcast %296 : vector<1x2xf32> to vector<2x2xf32>
    %298 = arith.addf %295, %297 : vector<2x2xf32>
    %c0_80 = arith.constant 0 : index
    %c0_81 = arith.constant 0 : index
    %299 = vector.load %arg5[%c0_80, %c0_81] : memref<2x2xf32, #tpu.memory_space<vmem>>, vector<2x2xf32>
    tpu.vector_store %arg5[%c0_80, %c0_81], %298 {strides = array<i32>} : memref<2x2xf32, #tpu.memory_space<vmem>>, vector<2x2xf32>,
    return
  }
}

</mosaic_0001>

<bundles_post_ra>
// kernel: tpu_custom_call.1
= control target key start
LH: loop header
LB: loop body
LE: loop exit
PB: predicated region body
PF: predicated region fallthrough
CT: control target
= control target key end

     0   :  { %10 = vsyncpa [#allocation3], 0  ;;  %s2740_s0 = inlined_call_operand.hbm [shape: f32[16,12], index: 0, kind: input, shape index: {}]   ;;  %s2741_s1 = inlined_call_operand.hbm [shape: f32[16,20], index: 1, kind: input, shape index: {}]   ;;  %s2742_s2 = inlined_call_operand.vmem [shape: f32[2,6], index: 2, kind: input, shape index: {}]   ;;  %s2743_s3 = inlined_call_operand.vmem [shape: s32[2,8], index: 3, kind: input, shape index: {}]   ;;  %s2744_s4 = inlined_call_operand.hbm [shape: f32[624,256], index: 4, kind: input, shape index: {}]   ;;  %s2745_s5 = inlined_call_operand.hbm [shape: f32[2,2], index: 5, kind: output, shape index: {}]  }
   0x1   :  { %11 = vsyncpa [#allocation6], 0 }
   0x2   :  { %12 = vsyncpa [#allocation4], 0  ;;  %s2388_s18 = smov [#allocation5]   ;;  %s2389_s20 = smov [#allocation2]  }
   0x3   :  { %s30_s19 = sshll.u32 %s2388_s18, 4  ;;  %s18_s21 = sshll.u32 %s2389_s20, 4  ;;  %s31_s19 = int_to_ptr.vmem [resolvable:$true] %s30_s19  ;;  %s19_s21 = int_to_ptr.vmem [resolvable:$true] %s18_s21 }
   0x4   :  { %s2310_s22 = scalar_lea.vmem %s31_s19, 256  ;;  %p2315_p1 = scmp.lt.s32.totalorder %s31_s19, %s31_s19 }
   0x5   :  { %p2311_p0 = scmp.ne.s32.totalorder %s31_s19, %s2310_s22  ;;  %p2316_p2 = scmp.lt.s32.totalorder %s2310_s22, %s2310_s22 }
   0x7   :  { %p2317_p3 = por %p2316_p2, %p2315_p1 }
   0x9   :  { %p2318_p4 = pnand %p2317_p3, %p2311_p0 }
   0xb   :  { %2321 = shalt.err (!%p2318_p4)
}
   0xc   :  { %s2390_s23 = smov 128   ;;  %s2391_s24 = smov 8  }
   0xd   :  { %36 = dma.hbm_to_vmem [thread:$0]  %s2741_s1, 256, %s31_s19, [#allocation6], %s2390_s23, %s2390_s23, %s2391_s24  }
   0xe   :  { %s2330_s27 = scalar_lea.vmem %s19_s21, 256  ;;  %p2335_p6 = scmp.lt.s32.totalorder %s19_s21, %s19_s21 }
   0xf   :  { %p2331_p5 = scmp.ne.s32.totalorder %s19_s21, %s2330_s27  ;;  %p2336_p7 = scmp.lt.s32.totalorder %s2330_s27, %s2330_s27 }
  0x11   :  { %p2337_p8 = por %p2336_p7, %p2335_p6 }
  0x13   :  { %p2338_p9 = pnand %p2337_p8, %p2331_p5 }
  0x15   :  { %2341 = shalt.err (!%p2338_p9)
}
  0x16   :  { %24 = dma.hbm_to_vmem [thread:$0]  %s2740_s0, 256, %s19_s21, [#allocation3], %s2390_s23, %s2390_s23, %s2391_s24  }
  0x17   :  { %s2392_s30 = smov [#allocation7]  }
  0x18   :  { %s46_s6 = sshll.u32 %s2392_s30, 4  ;;  %s47_s6 = int_to_ptr.vmem [resolvable:$true] %s46_s6 }
  0x19   :  { %s2350_s7 = scalar_lea.vmem %s47_s6, 19968  ;;  %p2355_p11 = scmp.lt.s32.totalorder %s47_s6, %s47_s6 }
  0x1a   :  { %p2351_p10 = scmp.ne.s32.totalorder %s47_s6, %s2350_s7  ;;  %p2356_p12 = scmp.lt.s32.totalorder %s2350_s7, %s2350_s7 }
  0x1c   :  { %p2357_p13 = por %p2356_p12, %p2355_p11 }
  0x1e   :  { %p2358_p0 = pnand %p2357_p13, %p2351_p10 }
  0x20   :  { %2361 = shalt.err (!%p2358_p0)
}
  0x21   :  { %s2393_s1 = smov 256   ;;  %s2394_s8 = smov 16  }
  0x22   :  { %52 = dma.hbm_to_vmem [thread:$0]  %s2744_s4, 19968, %s47_s6, [#allocation6], %s2393_s1, %s2393_s1, %s2394_s8  }
  0x23   :  { %2382 = dma.done.wait [#allocation3], 256  }
  0x24   :  { %2383 = vsyncadd [#allocation3], 4294967040 }
  0x25   :  { %2384 = dma.done.wait [#allocation6], 20224  }
  0x26   :  { %2385 = vsyncadd [#allocation6], 4294947072  ;;  %vm74_vm0 = vcmask 1043456   ;;  %vm67_vm1 = vcmask 97280   ;;  %v65_v0 = vld [vmem:[#allocation7 + $0x10] sm:$0xf] }
  0x27   :  { %v64_v1 = vld [vmem:[#allocation7] sm:$0xff]  ;;  %2056 = vmatprep.subr.msk.mxu0 %vm74_vm0, %v65_v0  ;;  %v63_v3 = vld [vmem:[#allocation2 + $0x8] sm:$0xff]  ;;  %v240_v5 = vld [vmem:[#allocation5] sm:$0xff]  ;;  %vm246_vm2 = vcmask 162816   ;;  %vm156_vm3 = vcmask 130048   ;;  %vm340_vm4 = vcmask 523264  }
  0x28   :  { %v62_v2 = vld [vmem:[#allocation2] sm:$0xff]  ;;  %2057 = vmatpush3.msk.msra.mxu0 %vm74_vm0, %v65_v0  ;;  %v243_v6 = vld [vmem:[#allocation7 + $0x70] sm:$0xff]  ;;  %v241_v8 = vld [vmem:[#allocation5 + $0x8] sm:$0xff]  ;;  %v2395_v62 = vmov 0.0   ;;  %s2396_s0 = smov 32   ;;  %vm432_vm5 = vcmask 261120  }
  0x29   :  { %2060 = vmatprep.mubr.msk.f32.mxu0 %vm67_vm1, %v62_v2  ;;  %v244_v4 = vld [vmem:[#allocation7 + $0x80] sm:$0xf]  ;;  %2058 = vmatprep.subr.mxu0 %v64_v1  ;;  %v153_v10 = vld [vmem:[#allocation7 + $0x30] sm:$0xff]  ;;  %v450_v29 = vld [vmem:[#allocation7 + $0x1f8] sm:$0xff]  ;;  %s2397_s4 = smov 64   ;;  %vm1430_vm6 = vcmask 1045504  }
  0x2a   :  { %2059 = vmatpush3.msra.mxu0 %v64_v1  ;;  %v242_v7 = vld [vmem:[#allocation7 + $0x60] sm:$0xff]  ;;  %v338_v11 = vld [vmem:[#allocation7 + $0x110] sm:$0xff]  ;;  %v2448_v30 = vld [vmem:[#allocation7 + $0x278] sm:$0xff]  ;;  %vm2398_vm7 = vmmov 0   ;;  %vm1426_vm8 = vcmask 48128   ;;  %vm1585_vm9 = vcmask 64512  }
  0x2b   :  { %2061 = vmatmul.mubr.msk.f32.vlgmr.msra.gmra.mxu0 %vm67_vm1, %v63_v3  ;;  %2070 = vmatprep.subr.msk.mxu0 %vm74_vm0, %v244_v4  ;;  %v154_v9 = vld [vmem:[#allocation7 + $0x40] sm:$0xff]  ;;  %v245_v19 = vld [vmem:[#allocation7 + $0x90] ss:$0 sm:$0xff]  ;;  %v448_v33 = vld [vmem:[#allocation7 + $0x1e8] sm:$0xff]  ;;  %vm1758_vm10 = vcmask 785408   ;;  %s2400_s14 = smov [#allocation8]  }
  0x2c   :  { %2071 = vmatpush3.msk.msra.mxu0 %vm74_vm0, %v244_v4  ;;  %2076 = vmatprep.mubr.msk.f32.mxu0 %vm246_vm2, %v240_v5  ;;  %v66_v13 = vld [vmem:[#allocation7 + $0x20] ss:$0 sm:$0xff]  ;;  %v336_v20 = vld [vmem:[#allocation7 + $0xf0] sm:$0xff]  ;;  %v2453_v34 = vld [vmem:[#allocation7 + $0x268] sm:$0xff]  ;;  %s1940_s15 = sshll.u32 %s2400_s14, 4  ;;  %vm1932_vm11 = vcmask 9216   ;;  %s1941_s15 = int_to_ptr.vmem [resolvable:$true] %s1940_s15 }
  0x2d   :  { %2072 = vmatprep.subr.mxu0 %v243_v6  ;;  %2063 = vmatprep.subr.mxu1 %v154_v9  ;;  %v337_v17 = vld [vmem:[#allocation7 + $0x100] sm:$0xff]  ;;  %v334_v24 = vld [vmem:[#allocation7 + $0xd0] sm:$0xff]  ;;  %v446_v37 = vld [vmem:[#allocation7 + $0x1d8] sm:$0xff]  ;;  %s2362_s16 = scalar_lea.vmem %s1941_s15, 32  ;;  %p2367_p2 = scmp.lt.s32.totalorder %s1941_s15, %s1941_s15 }
  0x2e   :  { %2073 = vmatpush3.msra.mxu0 %v243_v6  ;;  %2064 = vmatpush3.msra.mxu1 %v154_v9  ;;  %v335_v22 = vld [vmem:[#allocation7 + $0xe0] sm:$0xff]  ;;  %v332_v26 = vld [vmem:[#allocation7 + $0xb0] sm:$0xff]  ;;  %v2459_v38 = vld [vmem:[#allocation7 + $0x258] sm:$0xff]  ;;  %p2363_p1 = scmp.ne.s32.totalorder %s1941_s15, %s2362_s16  ;;  %p2368_p3 = scmp.lt.s32.totalorder %s2362_s16, %s2362_s16 }
  0x2f   :  { %2074 = vmatprep.subr.mxu0 %v242_v7  ;;  %2065 = vmatprep.subr.mxu1 %v153_v10  ;;  %v333_v25 = vld [vmem:[#allocation7 + $0xc0] sm:$0xff]  ;;  %v449_v31 = vld [vmem:[#allocation7 + $0x1f0] sm:$0xff]  ;;  %v444_v41 = vld [vmem:[#allocation7 + $0x1c8] sm:$0xff] }
  0x30   :  { %2075 = vmatpush3.msra.mxu0 %v242_v7  ;;  %2066 = vmatpush3.msra.mxu1 %v153_v10  ;;  %v331_v27 = vld [vmem:[#allocation7 + $0xa0] sm:$0xff]  ;;  %v2451_v32 = vld [vmem:[#allocation7 + $0x270] sm:$0xff]  ;;  %v2464_v42 = vld [vmem:[#allocation7 + $0x248] sm:$0xff]  ;;  %p2369_p4 = por %p2368_p3, %p2367_p2 }
  0x31   :  { %2077 = vmatmul.mubr.msk.f32.vlgmr.msra.gmra.mxu0 %vm246_vm2, %v241_v8  ;;  %2079 = vmatprep.subr.mxu1 %v338_v11  ;;  %v447_v35 = vld [vmem:[#allocation7 + $0x1e0] sm:$0xff]  ;;  %v445_v39 = vld [vmem:[#allocation7 + $0x1d0] sm:$0xff]  ;;  %v442_v45 = vld [vmem:[#allocation7 + $0x1b8] sm:$0xff] }
  0x32   :  { %486 = vmatprep.subr.mxu0 %v450_v29  ;;  %v2456_v36 = vld [vmem:[#allocation7 + $0x260] sm:$0xff]  ;;  %v2461_v40 = vld [vmem:[#allocation7 + $0x250] sm:$0xff]  ;;  %v2470_v46 = vld [vmem:[#allocation7 + $0x238] sm:$0xff]  ;;  %534 = vmatprep.mubr.f32.mxu0 %v2395_v62  ;;  %p2370_p5 = pnand %p2369_p4, %p2363_p1 }
  0x33   :  { %487 = vmatpush1.msra.mxu0 %v449_v31  ;;  %v443_v43 = vld [vmem:[#allocation7 + $0x1c0] sm:$0xff]  ;;  %v441_v47 = vld [vmem:[#allocation7 + $0x1b0] sm:$0xff]  ;;  %v440_v49 = vld [vmem:[#allocation7 + $0x1a8] sm:$0xff] }
  0x34   :  { %488 = vmatprep.subr.mxu0 %v448_v33  ;;  %v2467_v44 = vld [vmem:[#allocation7 + $0x240] sm:$0xff]  ;;  %v2473_v48 = vld [vmem:[#allocation7 + $0x230] sm:$0xff]  ;;  %v2476_v50 = vld [vmem:[#allocation7 + $0x228] sm:$0xff] }
  0x35   :  { %489 = vmatpush1.msra.mxu0 %v447_v35  ;;  %v439_v51 = vld [vmem:[#allocation7 + $0x1a0] sm:$0xff]  ;;  %v438_v53 = vld [vmem:[#allocation7 + $0x198] sm:$0xff]  ;;  %v437_v55 = vld [vmem:[#allocation7 + $0x190] sm:$0xff] }
  0x36   :  { %490 = vmatprep.subr.mxu0 %v446_v37  ;;  %v2479_v52 = vld [vmem:[#allocation7 + $0x220] sm:$0xff]  ;;  %v2482_v54 = vld [vmem:[#allocation7 + $0x218] sm:$0xff]  ;;  %v2487_v56 = vld [vmem:[#allocation7 + $0x210] sm:$0xff] }
  0x37   :  { %491 = vmatpush1.msra.mxu0 %v445_v39  ;;  %v436_v57 = vld [vmem:[#allocation7 + $0x188] sm:$0xff]  ;;  %v435_v59 = vld [vmem:[#allocation7 + $0x180] sm:$0xff]  ;;  %v155_v7 = vld [vmem:[#allocation7 + $0x50] ss:$0 sm:$0xff] }
  0x38   :  { %492 = vmatprep.subr.mxu0 %v444_v41  ;;  %v2490_v58 = vld [vmem:[#allocation7 + $0x208] sm:$0xff]  ;;  %v2493_v60 = vld [vmem:[#allocation7 + $0x200] sm:$0xff] }
  0x39   :  { %493 = vmatpush1.msra.mxu0 %v443_v43  ;;  %v339_v0 = vld [vmem:[#allocation7 + $0x120] ss:$0 sm:$0xff] }
  0x3a   :  { %494 = vmatprep.subr.mxu0 %v442_v45 }
  0x3b   :  { %495 = vmatpush1.msra.mxu0 %v441_v47 }
  0x3c   :  { %496 = vmatprep.subr.mxu0 %v440_v49 }
  0x3d   :  { %497 = vmatpush1.msra.mxu0 %v439_v51 }
  0x3e   :  { %498 = vmatprep.subr.mxu0 %v438_v53 }
  0x3f   :  { %499 = vmatpush1.msra.mxu0 %v437_v55 }
  0x40   :  { %500 = vmatprep.subr.mxu0 %v436_v57 }
  0x41   :  { %501 = vmatpush1.msra.mxu0 %v435_v59 }
  0x42   :  { %682 = vmatprep.subr.mxu0 %v2448_v30 }
  0xeb   :  { %v2062_v12 = vpop.f32.mrf.mxu0 }
  0xec   :  { %v150_v16 = vadd.f32 %v2062_v12, %v66_v13 }
  0xed   :  { %v144_v14 = vpop.f32.mrf.mxu0 }
  0xee   :  { %v145_v15 = vadd.f32 %v144_v14, %v66_v13 }
  0xf0   :  { %2067 = vmatprep.mubr.msk.f32.mxu1 %vm156_vm3, %v145_v15 }
  0xf1   :  { %2068 = vmatmul.mubr.msk.f32.vlgmr.msra.gmra.mxu1 %vm156_vm3, %v150_v16  ;;  %v2078_v18 = vpop.f32.mrf.mxu0  ;;  %v454_v16 = vlaneseq }
  0xf2   :  { %2080 = vmatpush3.msra.mxu1 %v338_v11  ;;  %v328_v28 = vadd.f32 %v2078_v18, %v245_v19 }
  0xf3   :  { %2081 = vmatprep.subr.mxu1 %v337_v17  ;;  %v322_v21 = vpop.f32.mrf.mxu0 }
  0xf4   :  { %2082 = vmatpush3.msra.mxu1 %v337_v17  ;;  %v323_v23 = vadd.f32 %v322_v21, %v245_v19  ;;  %v455_v17 = vshrl.u32 %v454_v16, 7  ;;  %v452_v19 = vld [vmem:[#allocation7 + $0x280] ss:$8 sm:$0x3] }
  0xf5   :  { %2083 = vmatprep.subr.mxu1 %v336_v20 }
  0xf6   :  { %2084 = vmatpush3.msra.mxu1 %v336_v20  ;;  %2095 = vmatprep.mubr.msk.f32.mxu1 %vm340_vm4, %v323_v23  ;;  %v456_v18 = vsub.s32 0, %v455_v17  ;;  %v460_v29 = vsub.s32 1, %v455_v17 }
  0xf7   :  { %2085 = vmatprep.subr.mxu1 %v335_v22 }
  0xf8   :  { %2086 = vmatpush3.msra.mxu1 %v335_v22  ;;  %v457_v20 = vrot.slane %v452_v19, %v456_v18  ;;  %v2543_v31 = vrot.slane %v452_v19, %v460_v29 }
  0xf9   :  { %2087 = vmatprep.subr.mxu1 %v334_v24 }
  0xfa   :  { %2088 = vmatpush3.msra.mxu1 %v334_v24 }
  0xfb   :  { %2089 = vmatprep.subr.mxu1 %v333_v25 }
  0xfc   :  { %2090 = vmatpush3.msra.mxu1 %v333_v25 }
  0xfd   :  { %2091 = vmatprep.subr.mxu1 %v332_v26 }
  0xfe   :  { %2092 = vmatpush3.msra.mxu1 %v332_v26 }
  0xff   :  { %2093 = vmatprep.subr.mxu1 %v331_v27 }
 0x100   :  { %2094 = vmatpush3.msra.mxu1 %v331_v27 }
 0x101   :  { %2096 = vmatmul.mubr.msk.f32.vlgmr.msra.gmra.mxu1 %vm340_vm4, %v328_v28  ;;  %582 = vmatprep.subr.mxu1 %v2448_v30 }
 0x102   :  { %583 = vmatpush1.msra.mxu1 %v2451_v32  ;;  %630 = vmatprep.mubr.f32.mxu1 %v2395_v62 }
 0x103   :  { %584 = vmatprep.subr.mxu1 %v2453_v34 }
 0x104   :  { %585 = vmatpush1.msra.mxu1 %v2456_v36 }
 0x105   :  { %586 = vmatprep.subr.mxu1 %v2459_v38 }
 0x106   :  { %587 = vmatpush1.msra.mxu1 %v2461_v40 }
 0x107   :  { %588 = vmatprep.subr.mxu1 %v2464_v42 }
 0x108   :  { %589 = vmatpush1.msra.mxu1 %v2467_v44 }
 0x109   :  { %590 = vmatprep.subr.mxu1 %v2470_v46 }
 0x10a   :  { %591 = vmatpush1.msra.mxu1 %v2473_v48 }
 0x10b   :  { %592 = vmatprep.subr.mxu1 %v2476_v50 }
 0x10c   :  { %593 = vmatpush1.msra.mxu1 %v2479_v52 }
 0x10d   :  { %594 = vmatprep.subr.mxu1 %v2482_v54 }
 0x10e   :  { %595 = vmatpush1.msra.mxu1 %v2487_v56 }
 0x10f   :  { %596 = vmatprep.subr.mxu1 %v2490_v58 }
 0x110   :  { %597 = vmatpush1.msra.mxu1 %v2493_v60 }
 0x111   :  { %631 = vmatmul.mubr.f32.vlgmr.msra.gmra.mxu1 %v2395_v62  ;;  %792 = vmatprep.subr.mxu1 %v2448_v30 }
 0x112   :  { %840 = vmatprep.mubr.f32.mxu1 %v2395_v62  ;;  %793 = vmatpush1.msra.mxu1 %v2451_v32 }
 0x113   :  { %794 = vmatprep.subr.mxu1 %v2453_v34 }
 0x114   :  { %795 = vmatpush1.msra.mxu1 %v2456_v36 }
 0x115   :  { %796 = vmatprep.subr.mxu1 %v2459_v38 }
 0x116   :  { %797 = vmatpush1.msra.mxu1 %v2461_v40 }
 0x117   :  { %798 = vmatprep.subr.mxu1 %v2464_v42 }
 0x118   :  { %799 = vmatpush1.msra.mxu1 %v2467_v44 }
 0x119   :  { %800 = vmatprep.subr.mxu1 %v2470_v46 }
 0x11a   :  { %801 = vmatpush1.msra.mxu1 %v2473_v48 }
 0x11b   :  { %802 = vmatprep.subr.mxu1 %v2476_v50 }
 0x11c   :  { %803 = vmatpush1.msra.mxu1 %v2479_v52 }
 0x11d   :  { %804 = vmatprep.subr.mxu1 %v2482_v54 }
 0x11e   :  { %805 = vmatpush1.msra.mxu1 %v2487_v56 }
 0x11f   :  { %806 = vmatprep.subr.mxu1 %v2490_v58 }
 0x120   :  { %807 = vmatpush1.msra.mxu1 %v2493_v60 }
 0x121   :  { %1012 = vmatprep.subr.mxu1 %v2448_v30 }
 0x1b1   :  { %v2069_v61 = vpop.f32.mrf.mxu1 }
 0x1b2   :  { %v235_v9 = vadd.f32 %v2069_v61, %v155_v7 }
 0x1b3   :  { %v229_v63 = vpop.f32.mrf.mxu1 }
 0x1b4   :  { %v230_v8 = vadd.f32 %v229_v63, %v155_v7  ;;  %v239_v14 = vmax.f32 %v235_v9, 0.0 }
 0x1b6   :  { %v238_v10 = vmax.f32 %v230_v8, 0.0 }
 0x1c1   :  { %v2097_v1 = vpop.f32.mrf.mxu1 }
 0x1c2   :  { %v419_v2 = vadd.f32 %v2097_v1, %v339_v0 }
 0x1c3   :  { %v413_v3 = vpop.f32.mrf.mxu1 }
 0x1c4   :  { %v423_v4 = vmax.f32 %v419_v2, 0.0  ;;  %v414_v5 = vadd.f32 %v413_v3, %v339_v0 }
 0x1c6   :  { %v422_v6 = vmax.f32 %v414_v5, 0.0  ;;  %428 = vrot.lane.b32.xlu1 %v423_v4, %s2396_s0 }
 0x1c8   :  { %426 = vrot.lane.b32.xlu0 %v422_v6, %s2396_s0 }
 0x1d1   :  { %v632_v23 = vpop.f32.mrf.mxu1 }
 0x1d3   :  { %v634_v35 = vpop.f32.mrf.mxu1 }
 0x238   :  { %v429_v13 = vpop.permute.xlu1 %428 }
 0x239   :  { %v434_v15 = vsel %vm432_vm5, %v239_v14, %v429_v13 }
 0x23a   :  { %v427_v11 = vpop.permute.xlu0 %426 }
 0x23b   :  { %v433_v12 = vsel %vm432_vm5, %v238_v10, %v427_v11 }
 0x23c   :  { %1960 = vmatmul.mubr.msk.f32.vlgmr.msra.gmra.mxu0 %vm340_vm4, %v433_v12 }
 0x23d   :  { %540 = vmatprep.mubr.f32.mxu0 %v2395_v62  ;;  %683 = vmatpush1.msra.mxu0 %v2451_v32 }
 0x23e   :  { %684 = vmatprep.subr.mxu0 %v2453_v34 }
 0x23f   :  { %685 = vmatpush1.msra.mxu0 %v2456_v36 }
 0x240   :  { %1961 = vmatmul.mubr.msk.f32.gmra.mxu0 %vm340_vm4, %v434_v15  ;;  %686 = vmatprep.subr.mxu0 %v2459_v38 }
 0x241   :  { %687 = vmatpush1.msra.mxu0 %v2461_v40  ;;  %730 = vmatprep.mubr.f32.mxu0 %v2395_v62 }
 0x242   :  { %688 = vmatprep.subr.mxu0 %v2464_v42 }
 0x243   :  { %689 = vmatpush1.msra.mxu0 %v2467_v44 }
 0x244   :  { %690 = vmatprep.subr.mxu0 %v2470_v46 }
 0x245   :  { %691 = vmatpush1.msra.mxu0 %v2473_v48 }
 0x246   :  { %692 = vmatprep.subr.mxu0 %v2476_v50 }
 0x247   :  { %693 = vmatpush1.msra.mxu0 %v2479_v52 }
 0x248   :  { %694 = vmatprep.subr.mxu0 %v2482_v54 }
 0x249   :  { %695 = vmatpush1.msra.mxu0 %v2487_v56 }
 0x24a   :  { %696 = vmatprep.subr.mxu0 %v2490_v58 }
 0x24b   :  { %697 = vmatpush1.msra.mxu0 %v2493_v60 }
 0x24c   :  { %902 = vmatprep.subr.mxu0 %v2448_v30 }
 0x2fc   :  { %v536_v21 = vpop.f32.mrf.mxu0 }
 0x2fd   :  { %v2538_v22 = vadd.f32 %v536_v21, %v457_v20 }
 0x2fe   :  { %v538_v24 = vpop.f32.mrf.mxu0 }
 0x2ff   :  { %v637_v25 = vadd.f32 %v632_v23, %v2538_v22  ;;  %v2546_v33 = vadd.f32 %v538_v24, %v2543_v31 }
 0x300   :  { %v542_v26 = vpop.f32.mrf.mxu0 }
 0x301   :  { %v1962_v27 = vmul.f32 -1.442695, %v637_v25  ;;  %v2541_v28 = vadd.f32 %v542_v26, %v457_v20  ;;  %v638_v37 = vadd.f32 %v634_v35, %v2546_v33 }
 0x302   :  { %v2569_v2 = vpop.f32.mrf.mxu0 }
 0x303   :  { %2206 = vpow2.f32 %v1962_v27  ;;  %v1963_v49 = vmul.f32 -1.442695, %v638_v37 }
 0x304   :  { %2208 = vtanh.f32 %v638_v37 }
 0x310   :  { %v2207_v39 = vpop.eup %2206 }
 0x311   :  { %v642_v41 = vadd.f32 1.0, %v2207_v39  ;;  %v2209_v43 = vpop.eup %2208 }
 0x313   :  { %2210 = vrcp.f32 %v642_v41 }
 0x314   :  { %2212 = vpow2.f32 %v1963_v49 }
 0x320   :  { %v2211_v45 = vpop.eup %2210 }
 0x321   :  { %v653_v47 = vmul.f32 %v2211_v45, %v2209_v43  ;;  %v2213_v51 = vpop.eup %2212  ;;  %v652_v55 = vmul.f32 0.0, %v2211_v45 }
 0x322   :  { %v649_v53 = vadd.f32 1.0, %v2213_v51 }
 0x323   :  { %655 = vrot.lane.b32.xlu0 %v653_v47, %s2397_s4 }
 0x324   :  { %2214 = vrcp.f32 %v649_v53 }
 0x331   :  { %v2215_v61 = vpop.eup %2214 }
 0x395   :  { %v656_v57 = vpop.permute.xlu0 %655 }
 0x396   :  { %v658_v59 = vadd.f32 %v656_v57, %v652_v55 }
 0x398   :  { %2216 = vtanh.f32 %v658_v59  ;;  %v759_v13 = vrot.slane %v658_v59, 6 }
 0x3a5   :  { %v2217_v63 = vpop.eup %2216 }
 0x3a6   :  { %v660_v0 = vmul.f32 %v2217_v63, %v2215_v61 }
 0x3a8   :  { %662 = vrot.lane.b32.xlu1 %v660_v0, %s2397_s4 }
 0x41a   :  { %v663_v1 = vpop.permute.xlu1 %662 }
 0x41b   :  { %1964 = vmatmul.mubr.msk.f32.vlgmr.msra.gmra.mxu0 %vm340_vm4, %v663_v1 }
 0x41c   :  { %903 = vmatpush1.msra.mxu0 %v2451_v32  ;;  %950 = vmatprep.mubr.f32.mxu0 %v2395_v62 }
 0x41d   :  { %904 = vmatprep.subr.mxu0 %v2453_v34 }
 0x41e   :  { %905 = vmatpush1.msra.mxu0 %v2456_v36 }
 0x41f   :  { %906 = vmatprep.subr.mxu0 %v2459_v38 }
 0x420   :  { %907 = vmatpush1.msra.mxu0 %v2461_v40 }
 0x421   :  { %908 = vmatprep.subr.mxu0 %v2464_v42 }
 0x422   :  { %909 = vmatpush1.msra.mxu0 %v2467_v44 }
 0x423   :  { %910 = vmatprep.subr.mxu0 %v2470_v46 }
 0x424   :  { %911 = vmatpush1.msra.mxu0 %v2473_v48 }
 0x425   :  { %912 = vmatprep.subr.mxu0 %v2476_v50 }
 0x426   :  { %913 = vmatpush1.msra.mxu0 %v2479_v52 }
 0x427   :  { %914 = vmatprep.subr.mxu0 %v2482_v54 }
 0x428   :  { %915 = vmatpush1.msra.mxu0 %v2487_v56 }
 0x429   :  { %916 = vmatprep.subr.mxu0 %v2490_v58 }
 0x42a   :  { %917 = vmatpush1.msra.mxu0 %v2493_v60 }
 0x42b   :  { %1115 = vmatprep.subr.mxu0 %v2448_v30 }
 0x4db   :  { %v732_v3 = vpop.f32.mrf.mxu0 }
 0x4dc   :  { %v739_v4 = vrot.slane %v732_v3, 6 }
 0x4dd   :  { %v734_v7 = vpop.f32.mrf.mxu0 }
 0x4de   :  { %v743_v5 = vadd.f32 %v739_v4, %v2538_v22  ;;  %v740_v8 = vrot.slane %v734_v7, 6 }
 0x4e0   :  { %v1965_v6 = vmul.f32 -1.442695, %v743_v5  ;;  %v744_v9 = vadd.f32 %v740_v8, %v2546_v33 }
 0x4e2   :  { %2218 = vpow2.f32 %v1965_v6  ;;  %v1966_v17 = vmul.f32 -1.442695, %v744_v9 }
 0x4e3   :  { %2220 = vtanh.f32 %v744_v9 }
 0x4ef   :  { %v2219_v10 = vpop.eup %2218 }
 0x4f0   :  { %v748_v11 = vadd.f32 1.0, %v2219_v10  ;;  %v2221_v12 = vpop.eup %2220 }
 0x4f2   :  { %2222 = vrcp.f32 %v748_v11 }
 0x4f3   :  { %2224 = vpow2.f32 %v1966_v17 }
 0x4ff   :  { %v2223_v14 = vpop.eup %2222 }
 0x500   :  { %v762_v15 = vmul.f32 %v2223_v14, %v2221_v12  ;;  %v761_v16 = vmul.f32 %v2223_v14, %v759_v13  ;;  %v2225_v18 = vpop.eup %2224 }
 0x501   :  { %v755_v19 = vadd.f32 1.0, %v2225_v18 }
 0x502   :  { %764 = vrot.lane.b32.xlu0 %v762_v15, %s2397_s4 }
 0x503   :  { %2226 = vrcp.f32 %v755_v19 }
 0x510   :  { %v2227_v23 = vpop.eup %2226 }
 0x574   :  { %v765_v20 = vpop.permute.xlu0 %764 }
 0x575   :  { %v767_v21 = vadd.f32 %v765_v20, %v761_v16 }
 0x577   :  { %2228 = vtanh.f32 %v767_v21  ;;  %v869_v53 = vrot.slane %v767_v21, 6 }
 0x584   :  { %v2229_v24 = vpop.eup %2228 }
 0x585   :  { %v769_v25 = vmul.f32 %v2229_v24, %v2227_v23 }
 0x587   :  { %v771_v26 = vrot.slane %v769_v25, 2 }
 0x589   :  { %772 = vrot.lane.b32.xlu1 %v771_v26, %s2397_s4 }
 0x5fb   :  { %v773_v27 = vpop.permute.xlu1 %772 }
 0x5fc   :  { %1967 = vmatmul.mubr.msk.f32.vlgmr.msra.gmra.mxu1 %vm340_vm4, %v773_v27 }
 0x5fd   :  { %1013 = vmatpush1.msra.mxu1 %v2451_v32  ;;  %1060 = vmatprep.mubr.f32.mxu1 %v2395_v62 }
 0x5fe   :  { %1014 = vmatprep.subr.mxu1 %v2453_v34 }
 0x5ff   :  { %1015 = vmatpush1.msra.mxu1 %v2456_v36 }
 0x600   :  { %1016 = vmatprep.subr.mxu1 %v2459_v38 }
 0x601   :  { %1017 = vmatpush1.msra.mxu1 %v2461_v40 }
 0x602   :  { %1018 = vmatprep.subr.mxu1 %v2464_v42 }
 0x603   :  { %1019 = vmatpush1.msra.mxu1 %v2467_v44 }
 0x604   :  { %1020 = vmatprep.subr.mxu1 %v2470_v46 }
 0x605   :  { %1021 = vmatpush1.msra.mxu1 %v2473_v48 }
 0x606   :  { %1022 = vmatprep.subr.mxu1 %v2476_v50 }
 0x607   :  { %1023 = vmatpush1.msra.mxu1 %v2479_v52 }
 0x608   :  { %1024 = vmatprep.subr.mxu1 %v2482_v54 }
 0x609   :  { %1025 = vmatpush1.msra.mxu1 %v2487_v56 }
 0x60a   :  { %1026 = vmatprep.subr.mxu1 %v2490_v58 }
 0x60b   :  { %1027 = vmatpush1.msra.mxu1 %v2493_v60 }
 0x60c   :  { %1225 = vmatprep.subr.mxu1 %v2448_v30 }
 0x6bc   :  { %v842_v29 = vpop.f32.mrf.mxu1 }
 0x6bd   :  { %v849_v35 = vrot.slane %v842_v29, 4 }
 0x6be   :  { %v844_v41 = vpop.f32.mrf.mxu1 }
 0x6bf   :  { %v853_v37 = vadd.f32 %v849_v35, %v2538_v22  ;;  %v850_v43 = vrot.slane %v844_v41, 4 }
 0x6c1   :  { %v1968_v39 = vmul.f32 -1.442695, %v853_v37  ;;  %v854_v45 = vadd.f32 %v850_v43, %v2546_v33 }
 0x6c3   :  { %2230 = vpow2.f32 %v1968_v39  ;;  %v1969_v61 = vmul.f32 -1.442695, %v854_v45 }
 0x6c4   :  { %2232 = vtanh.f32 %v854_v45 }
 0x6d0   :  { %v2231_v47 = vpop.eup %2230 }
 0x6d1   :  { %v858_v49 = vadd.f32 1.0, %v2231_v47  ;;  %v2233_v51 = vpop.eup %2232  ;;  %v2640_v47 = vadd.f32 %v2569_v2, %v2543_v31 }
 0x6d3   :  { %2234 = vrcp.f32 %v858_v49 }
 0x6d4   :  { %2236 = vpow2.f32 %v1969_v61 }
 0x6e0   :  { %v2235_v55 = vpop.eup %2234 }
 0x6e1   :  { %v872_v57 = vmul.f32 %v2235_v55, %v2233_v51  ;;  %v871_v59 = vmul.f32 %v2235_v55, %v869_v53  ;;  %v2237_v63 = vpop.eup %2236 }
 0x6e2   :  { %v865_v0 = vadd.f32 1.0, %v2237_v63 }
 0x6e3   :  { %874 = vrot.lane.b32.xlu0 %v872_v57, %s2397_s4 }
 0x6e4   :  { %2238 = vrcp.f32 %v865_v0 }
 0x6f1   :  { %v2239_v4 = vpop.eup %2238 }
 0x755   :  { %v875_v1 = vpop.permute.xlu0 %874 }
 0x756   :  { %v877_v3 = vadd.f32 %v875_v1, %v871_v59 }
 0x758   :  { %2240 = vtanh.f32 %v877_v3  ;;  %v979_v19 = vrot.slane %v877_v3, 6 }
 0x765   :  { %v2241_v5 = vpop.eup %2240 }
 0x766   :  { %v879_v6 = vmul.f32 %v2241_v5, %v2239_v4 }
 0x768   :  { %v881_v7 = vrot.slane %v879_v6, 4 }
 0x76a   :  { %882 = vrot.lane.b32.xlu1 %v881_v7, %s2397_s4 }
 0x7dc   :  { %v883_v8 = vpop.permute.xlu1 %882 }
 0x7dd   :  { %1970 = vmatmul.mubr.msk.f32.vlgmr.msra.gmra.mxu0 %vm340_vm4, %v883_v8 }
 0x7de   :  { %1116 = vmatpush1.msra.mxu0 %v2451_v32  ;;  %1163 = vmatprep.mubr.f32.mxu0 %v2395_v62 }
 0x7df   :  { %1117 = vmatprep.subr.mxu0 %v2453_v34 }
 0x7e0   :  { %1118 = vmatpush1.msra.mxu0 %v2456_v36 }
 0x7e1   :  { %1119 = vmatprep.subr.mxu0 %v2459_v38 }
 0x7e2   :  { %1120 = vmatpush1.msra.mxu0 %v2461_v40 }
 0x7e3   :  { %1121 = vmatprep.subr.mxu0 %v2464_v42 }
 0x7e4   :  { %1122 = vmatpush1.msra.mxu0 %v2467_v44 }
 0x7e5   :  { %1123 = vmatprep.subr.mxu0 %v2470_v46 }
 0x7e6   :  { %1124 = vmatpush1.msra.mxu0 %v2473_v48 }
 0x7e7   :  { %1125 = vmatprep.subr.mxu0 %v2476_v50 }
 0x7e8   :  { %1126 = vmatpush1.msra.mxu0 %v2479_v52 }
 0x7e9   :  { %1127 = vmatprep.subr.mxu0 %v2482_v54 }
 0x7ea   :  { %1128 = vmatpush1.msra.mxu0 %v2487_v56 }
 0x7eb   :  { %1129 = vmatprep.subr.mxu0 %v2490_v58 }
 0x7ec   :  { %1130 = vmatpush1.msra.mxu0 %v2493_v60 }
 0x7ed   :  { %1335 = vmatprep.subr.mxu0 %v2448_v30 }
 0x89d   :  { %v952_v9 = vpop.f32.mrf.mxu0 }
 0x89e   :  { %v959_v10 = vrot.slane %v952_v9, 2 }
 0x89f   :  { %v954_v13 = vpop.f32.mrf.mxu0 }
 0x8a0   :  { %v963_v11 = vadd.f32 %v959_v10, %v2538_v22  ;;  %v960_v14 = vrot.slane %v954_v13, 2 }
 0x8a2   :  { %v1971_v12 = vmul.f32 -1.442695, %v963_v11  ;;  %v964_v15 = vadd.f32 %v960_v14, %v2546_v33 }
 0x8a4   :  { %2242 = vpow2.f32 %v1971_v12  ;;  %v1972_v30 = vmul.f32 -1.442695, %v964_v15 }
 0x8a5   :  { %2244 = vtanh.f32 %v964_v15 }
 0x8b1   :  { %v2243_v16 = vpop.eup %2242 }
 0x8b2   :  { %v968_v17 = vadd.f32 1.0, %v2243_v16  ;;  %v2245_v18 = vpop.eup %2244 }
 0x8b4   :  { %2246 = vrcp.f32 %v968_v17 }
 0x8b5   :  { %2248 = vpow2.f32 %v1972_v30 }
 0x8c1   :  { %v2247_v20 = vpop.eup %2246 }
 0x8c2   :  { %v982_v21 = vmul.f32 %v2247_v20, %v2245_v18  ;;  %v981_v23 = vmul.f32 %v2247_v20, %v979_v19  ;;  %v2249_v22 = vpop.eup %2248 }
 0x8c3   :  { %v975_v24 = vadd.f32 1.0, %v2249_v22 }
 0x8c4   :  { %984 = vrot.lane.b32.xlu0 %v982_v21, %s2397_s4 }
 0x8c5   :  { %2250 = vrcp.f32 %v975_v24 }
 0x8d2   :  { %v2251_v33 = vpop.eup %2250 }
 0x936   :  { %v985_v25 = vpop.permute.xlu0 %984 }
 0x937   :  { %v987_v26 = vadd.f32 %v985_v25, %v981_v23 }
 0x939   :  { %2252 = vtanh.f32 %v987_v26  ;;  %v1083_v57 = vrot.slane %v987_v26, 6 }
 0x946   :  { %v2253_v27 = vpop.eup %2252 }
 0x947   :  { %v989_v29 = vmul.f32 %v2253_v27, %v2251_v33 }
 0x949   :  { %v991_v35 = vrot.slane %v989_v29, 6 }
 0x94b   :  { %992 = vrot.lane.b32.xlu1 %v991_v35, %s2397_s4  ;;  %v1424_v35 = vld [vmem:[#allocation7 + $0x130] sm:$0x3f] }
 0x9bd   :  { %v993_v37 = vpop.permute.xlu1 %992 }
 0x9be   :  { %1973 = vmatmul.mubr.msk.f32.vlgmr.msra.gmra.mxu1 %vm340_vm4, %v993_v37  ;;  %v1423_v37 = vld [vmem:[%s2742_s2] sm:$0x3] }
 0x9bf   :  { %1226 = vmatpush1.msra.mxu1 %v2451_v32  ;;  %1273 = vmatprep.mubr.f32.mxu1 %v2395_v62 }
 0x9c0   :  { %1227 = vmatprep.subr.mxu1 %v2453_v34 }
 0x9c1   :  { %1228 = vmatpush1.msra.mxu1 %v2456_v36 }
 0x9c2   :  { %1229 = vmatprep.subr.mxu1 %v2459_v38 }
 0x9c3   :  { %1230 = vmatpush1.msra.mxu1 %v2461_v40 }
 0x9c4   :  { %1231 = vmatprep.subr.mxu1 %v2464_v42 }
 0x9c5   :  { %1232 = vmatpush1.msra.mxu1 %v2467_v44 }
 0x9c6   :  { %1233 = vmatprep.subr.mxu1 %v2470_v46 }
 0x9c7   :  { %1234 = vmatpush1.msra.mxu1 %v2473_v48 }
 0x9c8   :  { %1235 = vmatprep.subr.mxu1 %v2476_v50 }
 0x9c9   :  { %1236 = vmatpush1.msra.mxu1 %v2479_v52 }
 0x9ca   :  { %1237 = vmatprep.subr.mxu1 %v2482_v54 }
 0x9cb   :  { %1238 = vmatpush1.msra.mxu1 %v2487_v56 }
 0x9cc   :  { %1239 = vmatprep.subr.mxu1 %v2490_v58 }
 0x9cd   :  { %1240 = vmatpush1.msra.mxu1 %v2493_v60 }
 0x9ce   :  { %2098 = vmatprep.subr.mxu1 %v2395_v62 }
 0xa7e   :  { %v1062_v39 = vpop.f32.mrf.mxu1 }
 0xa7f   :  { %v1067_v41 = vadd.f32 %v1062_v39, %v2541_v28 }
 0xa80   :  { %v1064_v45 = vpop.f32.mrf.mxu1 }
 0xa81   :  { %v1974_v43 = vmul.f32 -1.442695, %v1067_v41  ;;  %v1068_v49 = vadd.f32 %v1064_v45, %v2640_v47 }
 0xa83   :  { %2254 = vpow2.f32 %v1974_v43  ;;  %v1975_v0 = vmul.f32 -1.442695, %v1068_v49 }
 0xa84   :  { %2256 = vtanh.f32 %v1068_v49 }
 0xa90   :  { %v2255_v51 = vpop.eup %2254 }
 0xa91   :  { %v1072_v53 = vadd.f32 1.0, %v2255_v51  ;;  %v2257_v55 = vpop.eup %2256  ;;  %v1505_v51 = vld [vmem:[#allocation7 + $0x160] sm:$0xff] }
 0xa93   :  { %2258 = vrcp.f32 %v1072_v53  ;;  %v1504_v53 = vld [vmem:[#allocation7 + $0x150] sm:$0xff] }
 0xa94   :  { %2260 = vpow2.f32 %v1975_v0 }
 0xaa0   :  { %v2259_v59 = vpop.eup %2258 }
 0xaa1   :  { %v1086_v61 = vmul.f32 %v2259_v59, %v2257_v55  ;;  %v1085_v63 = vmul.f32 %v2259_v59, %v1083_v57  ;;  %v2261_v1 = vpop.eup %2260 }
 0xaa2   :  { %v1079_v3 = vadd.f32 1.0, %v2261_v1 }
 0xaa3   :  { %1088 = vrot.lane.b32.xlu0 %v1086_v61, %s2397_s4 }
 0xaa4   :  { %2262 = vrcp.f32 %v1079_v3  ;;  %v1667_v3 = vld [vmem:[#allocation7 + $0x320] sm:$0xff] }
 0xab1   :  { %v2263_v2 = vpop.eup %2262 }
 0xb15   :  { %v1089_v4 = vpop.permute.xlu0 %1088 }
 0xb16   :  { %v1091_v31 = vadd.f32 %v1089_v4, %v1085_v63  ;;  %v1425_v63 = vld [vmem:[#allocation7 + $0x140] ss:$0 sm:$0xff] }
 0xb18   :  { %2264 = vtanh.f32 %v1091_v31 }
 0xb25   :  { %v2265_v5 = vpop.eup %2264 }
 0xb26   :  { %v1093_v6 = vmul.f32 %v2265_v5, %v2263_v2  ;;  %v1665_v2 = vld [vmem:[#allocation7 + $0x300] sm:$0xff] }
 0xb27   :  { %v1581_v5 = vld [vmem:[%s2743_s3] sm:$0x3]  ;;  %s2399_s3 = smov 96  }
 0xb28   :  { %1095 = vrot.lane.b32.xlu1 %v1093_v6, %s2397_s4  ;;  %v1583_v6 = vld [vmem:[#allocation7 + $0x290] sm:$0xff] }
 0xb9a   :  { %v1096_v7 = vpop.permute.xlu1 %1095 }
 0xb9b   :  { %1976 = vmatmul.mubr.msk.f32.vlgmr.msra.gmra.mxu0 %vm340_vm4, %v1096_v7 }
 0xb9c   :  { %1336 = vmatpush1.msra.mxu0 %v2451_v32  ;;  %1383 = vmatprep.mubr.f32.mxu0 %v2395_v62 }
 0xb9d   :  { %1337 = vmatprep.subr.mxu0 %v2453_v34 }
 0xb9e   :  { %1338 = vmatpush1.msra.mxu0 %v2456_v36 }
 0xb9f   :  { %1339 = vmatprep.subr.mxu0 %v2459_v38 }
 0xba0   :  { %1340 = vmatpush1.msra.mxu0 %v2461_v40 }
 0xba1   :  { %1341 = vmatprep.subr.mxu0 %v2464_v42 }
 0xba2   :  { %1342 = vmatpush1.msra.mxu0 %v2467_v44 }
 0xba3   :  { %1343 = vmatprep.subr.mxu0 %v2470_v46 }
 0xba4   :  { %1344 = vmatpush1.msra.mxu0 %v2473_v48 }
 0xba5   :  { %1345 = vmatprep.subr.mxu0 %v2476_v50 }
 0xba6   :  { %1346 = vmatpush1.msra.mxu0 %v2479_v52  ;;  %v1192_v52 = vrot.slane %v1091_v31, 6  ;;  %v1666_v31 = vld [vmem:[#allocation7 + $0x310] sm:$0xff] }
 0xba7   :  { %1347 = vmatprep.subr.mxu0 %v2482_v54 }
 0xba8   :  { %1348 = vmatpush1.msra.mxu0 %v2487_v56 }
 0xba9   :  { %1349 = vmatprep.subr.mxu0 %v2490_v58 }
 0xbaa   :  { %1350 = vmatpush1.msra.mxu0 %v2493_v60 }
 0xbab   :  { %2110 = vmatprep.subr.mxu0 %v2395_v62 }
 0xc5b   :  { %v1165_v32 = vpop.f32.mrf.mxu0 }
 0xc5c   :  { %v1172_v34 = vrot.slane %v1165_v32, 6  ;;  %v1582_v32 = vcvt.s32.f32 %v1581_v5 }
 0xc5d   :  { %v1167_v40 = vpop.f32.mrf.mxu0 }
 0xc5e   :  { %v1176_v36 = vadd.f32 %v1172_v34, %v2541_v28  ;;  %v1173_v42 = vrot.slane %v1167_v40, 6  ;;  %v1664_v34 = vld [vmem:[#allocation7 + $0x2f0] sm:$0xff]  ;;  %v1661_v40 = vld [vmem:[#allocation7 + $0x2c0] sm:$0xff] }
 0xc60   :  { %v1977_v38 = vmul.f32 -1.442695, %v1176_v36  ;;  %v1177_v44 = vadd.f32 %v1173_v42, %v2640_v47  ;;  %v1663_v36 = vld [vmem:[#allocation7 + $0x2e0] sm:$0xff]  ;;  %v1660_v42 = vld [vmem:[#allocation7 + $0x2b0] sm:$0xff] }
 0xc62   :  { %2266 = vpow2.f32 %v1977_v38  ;;  %v1978_v60 = vmul.f32 -1.442695, %v1177_v44  ;;  %v1662_v38 = vld [vmem:[#allocation7 + $0x2d0] sm:$0xff] }
 0xc63   :  { %2268 = vtanh.f32 %v1177_v44 }
 0xc6f   :  { %v2267_v46 = vpop.eup %2266 }
 0xc70   :  { %v1181_v48 = vadd.f32 1.0, %v2267_v46  ;;  %v2269_v50 = vpop.eup %2268 }
 0xc72   :  { %2270 = vrcp.f32 %v1181_v48 }
 0xc73   :  { %2272 = vpow2.f32 %v1978_v60 }
 0xc7f   :  { %v2271_v54 = vpop.eup %2270 }
 0xc80   :  { %v1195_v56 = vmul.f32 %v2271_v54, %v2269_v50  ;;  %v1194_v58 = vmul.f32 %v2271_v54, %v1192_v52  ;;  %v2273_v8 = vpop.eup %2272  ;;  %v1584_v50 = vld [vmem:[#allocation7 + $0x2a0] ss:$0 sm:$0xff] }
 0xc81   :  { %v1188_v9 = vadd.f32 1.0, %v2273_v8 }
 0xc82   :  { %1197 = vrot.lane.b32.xlu0 %v1195_v56, %s2397_s4 }
 0xc83   :  { %2274 = vrcp.f32 %v1188_v9 }
 0xc90   :  { %v2275_v12 = vpop.eup %2274 }
 0xcf4   :  { %v1198_v10 = vpop.permute.xlu0 %1197 }
 0xcf5   :  { %v1200_v11 = vadd.f32 %v1198_v10, %v1194_v58 }
 0xcf7   :  { %2276 = vtanh.f32 %v1200_v11  ;;  %v1302_v26 = vrot.slane %v1200_v11, 6 }
 0xd04   :  { %v2277_v13 = vpop.eup %2276 }
 0xd05   :  { %v1202_v14 = vmul.f32 %v2277_v13, %v2275_v12 }
 0xd07   :  { %v1204_v15 = vrot.slane %v1202_v14, 2 }
 0xd09   :  { %1205 = vrot.lane.b32.xlu1 %v1204_v15, %s2397_s4 }
 0xd7b   :  { %v1206_v16 = vpop.permute.xlu1 %1205 }
 0xd7c   :  { %1979 = vmatmul.mubr.msk.f32.vlgmr.msra.gmra.mxu1 %vm340_vm4, %v1206_v16 }
 0xd7d   :  { %2099 = vmatpush3.msk.msra.mxu1 %vm1430_vm6, %v1424_v35  ;;  %2100 = vmatprep.mubr.msk.f32.mxu1 %vm2398_vm7, %v2395_v62 }
 0xd7e   :  { %2103 = vmatprep.subr.mxu1 %v2395_v62 }
 0xd80   :  { %2101 = vmatmul.mubr.msk.f32.vlgmr.msra.gmra.mxu1 %vm1426_vm8, %v1423_v37 }
 0xd81   :  { %2107 = vmatprep.mubr.msk.f32.mxu1 %vm2398_vm7, %v2395_v62  ;;  %2104 = vmatpush3.msra.mxu1 %v1505_v51  ;;  %v1768_v51 = vld [vmem:[#allocation7 + $0x3c0] sm:$0xff] }
 0xd82   :  { %2105 = vmatprep.subr.mxu1 %v2395_v62 }
 0xd83   :  { %2106 = vmatpush3.msra.mxu1 %v1504_v53  ;;  %v1767_v53 = vld [vmem:[#allocation7 + $0x3b0] sm:$0xff] }
 0xd84   :  { %2115 = vmatprep.subr.mxu1 %v2395_v62 }
 0xe3c   :  { %v1275_v17 = vpop.f32.mrf.mxu1 }
 0xe3d   :  { %v1282_v18 = vrot.slane %v1275_v17, 4 }
 0xe3e   :  { %v1277_v21 = vpop.f32.mrf.mxu1 }
 0xe3f   :  { %v1286_v19 = vadd.f32 %v1282_v18, %v2541_v28  ;;  %v1283_v23 = vrot.slane %v1277_v21, 4 }
 0xe40   :  { %v1500_v0 = vpop.f32.mrf.mxu1 }
 0xe41   :  { %v1980_v20 = vmul.f32 -1.442695, %v1286_v19  ;;  %v1287_v30 = vadd.f32 %v1283_v23, %v2640_v47  ;;  %v1501_v1 = vadd.f32 %v1500_v0, %v1425_v63  ;;  %v1762_v63 = vld [vmem:[#allocation7 + $0x360] sm:$0xff]  ;;  %v1761_v0 = vld [vmem:[#allocation7 + $0x350] sm:$0xff] }
 0xe42   :  { %v2102_v4 = vpop.f32.mrf.mxu1 }
 0xe43   :  { %2278 = vpow2.f32 %v1980_v20  ;;  %v1981_v39 = vmul.f32 -1.442695, %v1287_v30  ;;  %2108 = vmatmul.mubr.msk.f32.vlgmr.msra.gmra.mxu1 %vm156_vm3, %v1501_v1  ;;  %v1760_v1 = vld [vmem:[#allocation7 + $0x340] sm:$0xff]  ;;  %v1856_v4 = vld [vmem:[#allocation7 + $0x4b0] sm:$0xff] }
 0xe44   :  { %2280 = vtanh.f32 %v1287_v30  ;;  %2116 = vmatpush3.msra.mxu1 %v1667_v3  ;;  %2131 = vmatprep.mubr.msk.f32.mxu1 %vm2398_vm7, %v2395_v62  ;;  %v1506_v30 = vld [vmem:[#allocation7 + $0x170] ss:$0 sm:$0xff]  ;;  %v1857_v3 = vld [vmem:[#allocation7 + $0x4c0] sm:$0xff] }
 0xe45   :  { %2117 = vmatprep.subr.mxu1 %v2395_v62 }
 0xe46   :  { %2118 = vmatpush3.msra.mxu1 %v1666_v31  ;;  %v1668_v31 = vld [vmem:[#allocation7 + $0x330] ss:$0 sm:$0xff] }
 0xe47   :  { %2119 = vmatprep.subr.mxu1 %v2395_v62 }
 0xe48   :  { %2120 = vmatpush3.msra.mxu1 %v1665_v2  ;;  %v1855_v2 = vld [vmem:[#allocation7 + $0x4a0] sm:$0xff] }
 0xe49   :  { %2121 = vmatprep.subr.mxu1 %v2395_v62 }
 0xe4a   :  { %2122 = vmatpush3.msra.mxu1 %v1664_v34 }
 0xe4b   :  { %2123 = vmatprep.subr.mxu1 %v2395_v62 }
 0xe4c   :  { %2124 = vmatpush3.msra.mxu1 %v1663_v36  ;;  %v1853_v36 = vld [vmem:[#allocation7 + $0x480] sm:$0xff] }
 0xe4d   :  { %2125 = vmatprep.subr.mxu1 %v2395_v62 }
 0xe4e   :  { %2126 = vmatpush3.msra.mxu1 %v1662_v38 }
 0xe4f   :  { %2127 = vmatprep.subr.mxu1 %v2395_v62 }
 0xe50   :  { %v2279_v22 = vpop.eup %2278  ;;  %2128 = vmatpush3.msra.mxu1 %v1661_v40  ;;  %v1852_v40 = vld [vmem:[#allocation7 + $0x470] sm:$0xff] }
 0xe51   :  { %v1291_v24 = vadd.f32 1.0, %v2279_v22  ;;  %v2281_v25 = vpop.eup %2280  ;;  %2129 = vmatprep.subr.mxu1 %v2395_v62 }
 0xe52   :  { %2130 = vmatpush3.msra.mxu1 %v1660_v42 }
 0xe53   :  { %2282 = vrcp.f32 %v1291_v24  ;;  %2169 = vmatprep.subr.mxu1 %v2395_v62  ;;  %v1775_v24 = vld [vmem:[#allocation7 + $0x430] sm:$0xff] }
 0xe54   :  { %2284 = vpow2.f32 %v1981_v39 }
 0xe60   :  { %v2283_v33 = vpop.eup %2282 }
 0xe61   :  { %v1305_v27 = vmul.f32 %v2283_v33, %v2281_v25  ;;  %v1304_v29 = vmul.f32 %v2283_v33, %v1302_v26  ;;  %v2285_v41 = vpop.eup %2284  ;;  %v1774_v25 = vld [vmem:[#allocation7 + $0x420] sm:$0xff]  ;;  %v1773_v26 = vld [vmem:[#allocation7 + $0x410] sm:$0xff] }
 0xe62   :  { %v1298_v43 = vadd.f32 1.0, %v2285_v41  ;;  %v1770_v41 = vld [vmem:[#allocation7 + $0x3e0] sm:$0xff] }
 0xe63   :  { %1307 = vrot.lane.b32.xlu0 %v1305_v27, %s2397_s4  ;;  %v1772_v27 = vld [vmem:[#allocation7 + $0x400] sm:$0xff] }
 0xe64   :  { %2286 = vrcp.f32 %v1298_v43 }
 0xe71   :  { %v2287_v55 = vpop.eup %2286 }
 0xed5   :  { %v1308_v45 = vpop.permute.xlu0 %1307 }
 0xed6   :  { %v2679_v49 = vadd.f32 %v1308_v45, %v1304_v29  ;;  %v1771_v29 = vld [vmem:[#allocation7 + $0x3f0] sm:$0xff] }
 0xed7   :  { %v1769_v45 = vld [vmem:[#allocation7 + $0x3d0] sm:$0xff] }
 0xed8   :  { %2288 = vtanh.f32 %v2679_v49 }
 0xee5   :  { %v2289_v57 = vpop.eup %2288 }
 0xee6   :  { %v1312_v59 = vmul.f32 %v2289_v57, %v2287_v55  ;;  %v1766_v55 = vld [vmem:[#allocation7 + $0x3a0] sm:$0xff]  ;;  %v1765_v57 = vld [vmem:[#allocation7 + $0x390] sm:$0xff] }
 0xee8   :  { %v1314_v61 = vrot.slane %v1312_v59, 4  ;;  %v1764_v59 = vld [vmem:[#allocation7 + $0x380] sm:$0xff] }
 0xeea   :  { %1315 = vrot.lane.b32.xlu1 %v1314_v61, %s2397_s4  ;;  %v1763_v61 = vld [vmem:[#allocation7 + $0x370] sm:$0xff] }
 0xf03   :  { %v1576_v17 = vpop.f32.mrf.mxu1 }
 0xf04   :  { %v1577_v22 = vadd.f32 %v1576_v17, %v1506_v30 }
 0xf05   :  { %v2109_v18 = vpop.f32.mrf.mxu1 }
 0xf06   :  { %v1580_v33 = vmax.f32 %v1577_v22, 0.0 }
 0xf08   :  { %v1748_v37 = vrot.slane %v1580_v33, 2 }
 0xf5c   :  { %v1316_v7 = vpop.permute.xlu1 %1315 }
 0xf5d   :  { %1982 = vmatmul.mubr.msk.f32.vlgmr.msra.gmra.mxu0 %vm340_vm4, %v1316_v7  ;;  %v1854_v7 = vld [vmem:[#allocation7 + $0x490] sm:$0xff] }
 0xf5e   :  { %2111 = vmatpush3.msra.mxu0 %v1583_v6  ;;  %2112 = vmatprep.mubr.msk.f32.mxu0 %vm2398_vm7, %v2395_v62 }
 0xf5f   :  { %2134 = vmatprep.subr.mxu0 %v2395_v62 }
 0xf61   :  { %2113 = vmatmul.mubr.msk.f32.vlgmr.msra.gmra.mxu0 %vm1585_vm9, %v1582_v32 }
 0xf62   :  { %2166 = vmatprep.mubr.msk.f32.mxu0 %vm2398_vm7, %v2395_v62  ;;  %2135 = vmatpush3.msra.mxu0 %v1775_v24 }
 0xf63   :  { %2136 = vmatprep.subr.mxu0 %v2395_v62 }
 0xf64   :  { %2137 = vmatpush3.msra.mxu0 %v1774_v25 }
 0xf65   :  { %2138 = vmatprep.subr.mxu0 %v2395_v62 }
 0xf66   :  { %2139 = vmatpush3.msra.mxu0 %v1773_v26 }
 0xf67   :  { %2140 = vmatprep.subr.mxu0 %v2395_v62 }
 0xf68   :  { %2141 = vmatpush3.msra.mxu0 %v1772_v27 }
 0xf69   :  { %2142 = vmatprep.subr.mxu0 %v2395_v62 }
 0xf6a   :  { %2143 = vmatpush3.msra.mxu0 %v1771_v29 }
 0xf6b   :  { %2144 = vmatprep.subr.mxu0 %v2395_v62 }
 0xf6c   :  { %2145 = vmatpush3.msra.mxu0 %v1770_v41 }
 0xf6d   :  { %2146 = vmatprep.subr.mxu0 %v2395_v62 }
 0xf6e   :  { %2147 = vmatpush3.msra.mxu0 %v1769_v45 }
 0xf6f   :  { %2148 = vmatprep.subr.mxu0 %v2395_v62 }
 0xf70   :  { %2149 = vmatpush3.msra.mxu0 %v1768_v51 }
 0xf71   :  { %2150 = vmatprep.subr.mxu0 %v2395_v62 }
 0xf72   :  { %2151 = vmatpush3.msra.mxu0 %v1767_v53 }
 0xf73   :  { %2152 = vmatprep.subr.mxu0 %v2395_v62 }
 0xf74   :  { %2153 = vmatpush3.msra.mxu0 %v1766_v55 }
 0xf75   :  { %2154 = vmatprep.subr.mxu0 %v2395_v62 }
 0xf76   :  { %2155 = vmatpush3.msra.mxu0 %v1765_v57 }
 0xf77   :  { %2156 = vmatprep.subr.mxu0 %v2395_v62 }
 0xf78   :  { %2157 = vmatpush3.msra.mxu0 %v1764_v59 }
 0xf79   :  { %2158 = vmatprep.subr.mxu0 %v2395_v62 }
 0xf7a   :  { %2159 = vmatpush3.msra.mxu0 %v1763_v61 }
 0xf7b   :  { %2160 = vmatprep.subr.mxu0 %v2395_v62 }
 0xf7c   :  { %2161 = vmatpush3.msra.mxu0 %v1762_v63 }
 0xf7d   :  { %2162 = vmatprep.subr.mxu0 %v2395_v62 }
 0xf7e   :  { %2163 = vmatpush3.msra.mxu0 %v1761_v0 }
 0xf7f   :  { %2164 = vmatprep.subr.mxu0 %v2395_v62 }
 0xf80   :  { %2165 = vmatpush3.msra.mxu0 %v1760_v1 }
0x101d   :  { %v1385_v44 = vpop.f32.mrf.mxu0 }
0x101e   :  { %v1392_v46 = vrot.slane %v1385_v44, 2 }
0x101f   :  { %v1387_v48 = vpop.f32.mrf.mxu0 }
0x1020   :  { %v1396_v52 = vadd.f32 %v1392_v46, %v2541_v28  ;;  %v1393_v9 = vrot.slane %v1387_v48, 2  ;;  %v1412_v28 = vrot.slane %v2679_v49, 6 }
0x1021   :  { %v1655_v54 = vpop.f32.mrf.mxu0 }
0x1022   :  { %v1983_v56 = vmul.f32 -1.442695, %v1396_v52  ;;  %v1656_v58 = vadd.f32 %v1655_v54, %v1584_v50  ;;  %v1397_v10 = vadd.f32 %v1393_v9, %v2640_v47 }
0x1023   :  { %v2114_v60 = vpop.f32.mrf.mxu0 }
0x1024   :  { %2290 = vpow2.f32 %v1983_v56  ;;  %v1659_v8 = vmax.f32 %v1656_v58, 0.0  ;;  %v1984_v19 = vmul.f32 -1.442695, %v1397_v10  ;;  %v1851_v56 = vld [vmem:[#allocation7 + $0x460] sm:$0xff]  ;;  %v1850_v58 = vld [vmem:[#allocation7 + $0x450] sm:$0xff] }
0x1025   :  { %2292 = vtanh.f32 %v1397_v10  ;;  %v1776_v60 = vld [vmem:[#allocation7 + $0x440] ss:$0 sm:$0xff] }
0x1026   :  { %2132 = vmatmul.mubr.msk.f32.vlgmr.msra.gmra.mxu1 %vm340_vm4, %v1659_v8 }
0x1027   :  { %2185 = vmatprep.mubr.msk.f32.mxu1 %vm2398_vm7, %v2395_v62  ;;  %2170 = vmatpush3.msra.mxu1 %v1857_v3 }
0x1028   :  { %2171 = vmatprep.subr.mxu1 %v2395_v62 }
0x1029   :  { %2172 = vmatpush3.msra.mxu1 %v1856_v4 }
0x102a   :  { %2173 = vmatprep.subr.mxu1 %v2395_v62 }
0x102b   :  { %2174 = vmatpush3.msra.mxu1 %v1855_v2 }
0x102c   :  { %2175 = vmatprep.subr.mxu1 %v2395_v62 }
0x102d   :  { %2176 = vmatpush3.msra.mxu1 %v1854_v7 }
0x102e   :  { %2177 = vmatprep.subr.mxu1 %v2395_v62 }
0x102f   :  { %2178 = vmatpush3.msra.mxu1 %v1853_v36 }
0x1030   :  { %2179 = vmatprep.subr.mxu1 %v2395_v62 }
0x1031   :  { %v2291_v11 = vpop.eup %2290  ;;  %2180 = vmatpush3.msra.mxu1 %v1852_v40 }
0x1032   :  { %v1401_v12 = vadd.f32 1.0, %v2291_v11  ;;  %v2293_v13 = vpop.eup %2292  ;;  %2181 = vmatprep.subr.mxu1 %v2395_v62  ;;  %v1858_v11 = vld [vmem:[#allocation7 + $0x4d0] ss:$0 sm:$0xff] }
0x1033   :  { %2182 = vmatpush3.msra.mxu1 %v1851_v56 }
0x1034   :  { %2294 = vrcp.f32 %v1401_v12  ;;  %2183 = vmatprep.subr.mxu1 %v2395_v62 }
0x1035   :  { %2296 = vpow2.f32 %v1984_v19  ;;  %2184 = vmatpush3.msra.mxu1 %v1850_v58 }
0x1041   :  { %v2295_v14 = vpop.eup %2294 }
0x1042   :  { %v1415_v15 = vmul.f32 %v2295_v14, %v2293_v13  ;;  %v1414_v16 = vmul.f32 %v2295_v14, %v1412_v28  ;;  %v2297_v20 = vpop.eup %2296 }
0x1043   :  { %v1408_v21 = vadd.f32 1.0, %v2297_v20 }
0x1044   :  { %1417 = vrot.lane.b32.xlu0 %v1415_v15, %s2397_s4 }
0x1045   :  { %2298 = vrcp.f32 %v1408_v21 }
0x1052   :  { %v2299_v35 = vpop.eup %2298 }
0x10b6   :  { %v1418_v23 = vpop.permute.xlu0 %1417 }
0x10b7   :  { %v1420_v47 = vadd.f32 %v1418_v23, %v1414_v16 }
0x10b9   :  { %2300 = vtanh.f32 %v1420_v47 }
0x10c6   :  { %v2301_v39 = vpop.eup %2300 }
0x10c7   :  { %v1422_v43 = vmul.f32 %v2301_v39, %v2299_v35 }
0x10c9   :  { %v2201_v49 = vpack.i.bf16 %v1748_v37, %v1422_v43 }
0x10cb   :  { %2202 = vrot.lane.b32.xlu1 %v2201_v49, %s2397_s4 }
0x10e6   :  { %v1738_v5 = vpop.f32.mrf.mxu1 }
0x10e7   :  { %v1739_v6 = vadd.f32 %v1738_v5, %v1668_v31 }
0x10e8   :  { %v2133_v32 = vpop.f32.mrf.mxu1 }
0x10e9   :  { %v1742_v34 = vmax.f32 %v1739_v6, 0.0 }
0x10eb   :  { %v1753_v38 = vrot.slane %v1742_v34, 2 }
0x10ed   :  { %1754 = vrot.lane.b32.xlu0 %v1753_v38, %s2399_s3 }
0x113d   :  { %v2203_v42 = vpop.permute.xlu1 %2202 }
0x113e   :  { %v2205_v44 = vunpack.i.h.bf16 %v2203_v42  ;;  %v2204_v46 = vunpack.i.l.bf16 %v2203_v42 }
0x1140   :  { %v1757_v48 = vsel %vm340_vm4, %v2204_v46, %v2205_v44 }
0x115f   :  { %v1755_v50 = vpop.permute.xlu0 %1754 }
0x1160   :  { %v1759_v52 = vsel %vm1758_vm10, %v1757_v48, %v1755_v50 }
0x1161   :  { %v1778_v54 = vrot.slane %v1759_v52, 6 }
0x1163   :  { %2167 = vmatmul.mubr.f32.vlgmr.msra.gmra.mxu0 %v1778_v54 }
0x1223   :  { %v1846_v8 = vpop.f32.mrf.mxu0 }
0x1224   :  { %v1847_v9 = vadd.f32 %v1846_v8, %v1776_v60 }
0x1225   :  { %v2168_v10 = vpop.f32.mrf.mxu0 }
0x1226   :  { %2186 = vmatmul.mubr.msk.f32.vlgmr.msra.gmra.mxu1 %vm340_vm4, %v1847_v9 }
0x12e6   :  { %v1928_v12 = vpop.f32.mrf.mxu1 }
0x12e7   :  { %v1929_v13 = vadd.f32 %v1928_v12, %v1858_v11 }
0x12e8   :  { %v2187_v28 = vpop.f32.mrf.mxu1 }
0x12e9   :  { %1933 = vst.msk [vmem:[#allocation8] sm:$0x3] %vm1932_vm11, %v1929_v13 }
0x12ea   :  { %2373 = shalt.err (!%p2370_p5)
}
0x12eb   :  { %1943 = dma.vmem_to_hbm [thread:$0]  %s1941_s15, 32, %s2745_s5, [#allocation4]  }
0x12ec   :  { %2386 = dma.done.wait [#allocation4], 32  }
0x12ed   :  { %2387 = vsyncadd [#allocation4], 4294967264 }
0x12ee   :  { %1947 = vsyncpa [#allocation3], 1 }
0x12ef   :  { %1948 = vsyncpa [#allocation6], 1 }
0x12f0   :  { %1949 = vsyncpa [#allocation4], 1 }

</bundles_post_ra>
